<compile_context>
chip_gen: v6e
topology: v6e:2x2x1
jax: 0.10.0
libtpu: 0.0.40
codegen_flags: <defaults>
</compile_context>

<pallas_src>
import functools
import math

import jax
import jax.numpy as jnp
from jax import lax
from jax.experimental import pallas as pl
from jax.experimental.pallas import tpu as pltpu


# ---------------------------------------------------------------------------
# Fused  tap-GEMM -> LayerNorm2d -> [ReLU] -> [shortcut] -> [ReLU]  kernel
# ---------------------------------------------------------------------------
def _conv_ln_kernel(*refs, offsets, eps, relu_after_ln, mode, relu_after_add):
    x_ref, w_ref, g_ref, b_ref = refs[0], refs[1], refs[2], refs[3]
    o_ref = refs[-1]
    if mode == "add":
        xs_ref = refs[4]
    elif mode == "fused":
        xs_ref, wu_ref, gu_ref, bu_ref = refs[4], refs[5], refs[6], refs[7]

    c_out, tm = o_ref.shape
    inv_c = 1.0 / c_out

    # Tap-fused conv: sum over k*k static lane-offset slices (bf16 in, f32 acc).
    acc = jnp.dot(w_ref[0], x_ref[:, offsets[0]:offsets[0] + tm],
                  preferred_element_type=jnp.float32)
    for t in range(1, len(offsets)):
        off = offsets[t]
        acc = acc + jnp.dot(w_ref[t], x_ref[:, off:off + tm],
                            preferred_element_type=jnp.float32)

    # LayerNorm2d over the channel (sublane) axis, f32 statistics.
    mean = jnp.sum(acc, axis=0, keepdims=True) * inv_c
    diff = acc - mean
    var = jnp.sum(diff * diff, axis=0, keepdims=True) * inv_c
    y = diff * lax.rsqrt(var + eps)
    y = y * g_ref[...] + b_ref[...]
    if relu_after_ln:
        y = jnp.maximum(y, 0.0)

    if mode == "add":
        # identity shortcut
        y = y + xs_ref[...].astype(jnp.float32)
    elif mode == "fused":
        # upsample shortcut: 1x1 GEMM + LayerNorm2d fused into the epilogue
        sc = jnp.dot(wu_ref[...], xs_ref[...],
                     preferred_element_type=jnp.float32)
        mu = jnp.sum(sc, axis=0, keepdims=True) * inv_c
        ds = sc - mu
        vs = jnp.sum(ds * ds, axis=0, keepdims=True) * inv_c
        sc = ds * lax.rsqrt(vs + eps)
        sc = sc * gu_ref[...] + bu_ref[...]
        y = y + sc
    if relu_after_add:
        y = jnp.maximum(y, 0.0)

    o_ref[...] = y.astype(o_ref.dtype)


def _choose_tm(m, bytes_per_col, n_batch):
    """Largest multiple-of-128 divisor of m inside a ~10 MiB operand budget."""
    if m % 128 != 0:
        return m                      # full-axis block (exemption applies)
    budget = 10 * 1024 * 1024
    cap = max(128, budget // max(1, bytes_per_col))
    q = m // 128
    best = 128
    for d in range(1, q + 1):
        if q % d == 0 and 128 * d <= cap:
            best = 128 * d
    tm = best
    # v7x has 2 TensorCores: keep the "parallel" grid at >= 2 steps.
    if n_batch * (m // tm) < 2 and tm % 256 == 0:
        tm //= 2
    return tm


def _conv_ln(x_flat, w_taps, offsets, m_out, gamma, beta, *, eps,
             relu_after_ln, shortcut=None, relu_after_add=False,
             out_dtype=jnp.bfloat16):
    """x_flat: (N, Cin, L) bf16; w_taps: (T, Cout, Cin); out: (N, Cout, m_out)."""
    x_flat = x_flat.astype(jnp.bfloat16)
    N, c_in, L = (int(s) for s in x_flat.shape)
    T, c_out, c_in2 = (int(s) for s in w_taps.shape)
    assert c_in2 == c_in and T == len(offsets)
    max_off = max(offsets)
    assert L >= m_out + max_off
    if max_off > 0:
        assert shortcut is None       # residual only fused into 1x1 convs

    g2 = jnp.asarray(gamma, jnp.float32).reshape(c_out, 1)
    b2 = jnp.asarray(beta, jnp.float32).reshape(c_out, 1)

    mode, c_short = "none", 0
    xs = wu = gu = bu = None
    if shortcut is not None:
        mode = shortcut[0]
        xs = jnp.asarray(shortcut[1], jnp.bfloat16)
        assert int(xs.shape[0]) == N and int(xs.shape[2]) == m_out
        c_short = int(xs.shape[1])
        if mode == "add":
            assert c_short == c_out
        else:
            wu = jnp.asarray(shortcut[2], jnp.bfloat16).reshape(c_out, c_short)
            gu = jnp.asarray(shortcut[3], jnp.float32).reshape(c_out, 1)
            bu = jnp.asarray(shortcut[4], jnp.float32).reshape(c_out, 1)

    # Tile only the flattened spatial (lane) axis.  For tap-fused (k>1) convs
    # the tile is the whole per-batch image (tap slices need the halo).
    if max_off == 0:
        bytes_per_col = 2 * (c_in + c_short) + 6 * c_out
        tm = _choose_tm(m_out, bytes_per_col, N)
    else:
        tm = m_out
    n_mb = m_out // tm
    assert n_mb * tm == m_out

    in_specs = [
        pl.BlockSpec((None, c_in, tm + max_off), lambda n, i: (n, 0, i)),
        pl.BlockSpec((T, c_out, c_in), lambda n, i: (0, 0, 0)),
        pl.BlockSpec((c_out, 1), lambda n, i: (0, 0)),
        pl.BlockSpec((c_out, 1), lambda n, i: (0, 0)),
    ]
    args = [x_flat, w_taps.astype(jnp.bfloat16), g2, b2]
    if mode == "add":
        in_specs.append(pl.BlockSpec((None, c_out, tm), lambda n, i: (n, 0, i)))
        args.append(xs)
    elif mode == "fused":
        in_specs += [
            pl.BlockSpec((None, c_short, tm), lambda n, i: (n, 0, i)),
            pl.BlockSpec((c_out, c_short), lambda n, i: (0, 0)),
            pl.BlockSpec((c_out, 1), lambda n, i: (0, 0)),
            pl.BlockSpec((c_out, 1), lambda n, i: (0, 0)),
        ]
        args += [xs, wu, gu, bu]

    out_spec = pl.BlockSpec((None, c_out, tm), lambda n, i: (n, 0, i))

    # VMEM limit derived from the actual tile footprint (x2 for double buffer,
    # + f32 accumulator + slack) instead of a fixed constant.
    out_bytes = jnp.dtype(out_dtype).itemsize
    tile_bytes = (2 * c_in * (tm + max_off) + 2 * T * c_out * c_in
                  + 8 * c_out + out_bytes * c_out * tm + 4 * c_out * tm
                  + 2 * c_short * tm + 2 * c_out * c_short)
    vmem_limit = int(min(100 * 2 ** 20, max(16 * 2 ** 20,
                                            3 * tile_bytes + 4 * 2 ** 20)))

    kernel = functools.partial(
        _conv_ln_kernel, offsets=tuple(int(o) for o in offsets), eps=eps,
        relu_after_ln=relu_after_ln, mode=mode, relu_after_add=relu_after_add)

    return pl.pallas_call(
        kernel,
        out_shape=jax.ShapeDtypeStruct((N, c_out, m_out), out_dtype),
        grid=(N, n_mb),
        in_specs=in_specs,
        out_specs=out_spec,
        compiler_params=pltpu.CompilerParams(
            dimension_semantics=("parallel", "parallel"),
            vmem_limit_bytes=vmem_limit),
    )(*args)


# ---------------------------------------------------------------------------
# Convolution wrappers (padding / weight-prep glue in plain JAX)
# ---------------------------------------------------------------------------
def _conv1x1_ln(x_flat, w_oihw, gamma, beta, *, relu, shortcut=None,
                relu_after_add=False, eps=1e-6, out_dtype=jnp.bfloat16):
    O, I = int(w_oihw.shape[0]), int(w_oihw.shape[1])
    w_taps = w_oihw.reshape(1, O, I).astype(jnp.bfloat16)
    m = int(x_flat.shape[-1])
    return _conv_ln(x_flat, w_taps, (0,), m, gamma, beta, eps=eps,
                    relu_after_ln=relu, shortcut=shortcut,
                    relu_after_add=relu_after_add, out_dtype=out_dtype)


def _strip_wide(y_wide, O, Ho, Wp, Wo):
    N = y_wide.shape[0]
    return y_wide.reshape(N, O, Ho, Wp)[:, :, :, :Wo].reshape(N, O, Ho * Wo)


def _convkxk_ln(x_flat, H, W, w_oihw, padding, gamma, beta, *, relu, eps=1e-6):
    # Conv2d(k, stride=1, padding, bias=False) -> LayerNorm2d -> [ReLU]
    O, I, kh, kw = (int(s) for s in w_oihw.shape)
    assert kh == kw
    k = kh
    N = int(x_flat.shape[0])
    x4 = x_flat.reshape(N, I, H, W)
    xp = jnp.pad(x4, ((0, 0), (0, 0), (padding, padding), (padding, padding)))
    Hp, Wp = H + 2 * padding, W + 2 * padding
    Ho, Wo = Hp - k + 1, Wp - k + 1
    xf = jnp.pad(xp.reshape(N, I, Hp * Wp), ((0, 0), (0, 0), (0, k - 1)))
    offsets = tuple(dh * Wp + dw for dh in range(k) for dw in range(k))
    w_taps = jnp.transpose(w_oihw.reshape(O, I, k * k), (2, 0, 1))
    y_wide = _conv_ln(xf, w_taps.astype(jnp.bfloat16), offsets, Ho * Wp,
                      gamma, beta, eps=eps, relu_after_ln=relu)
    return _strip_wide(y_wide, O, Ho, Wp, Wo), Ho, Wo


def _deconvkxk_ln(x_flat, H, W, w_iohw, stride, padding, output_padding,
                  gamma, beta, *, relu, eps=1e-6):
    # ConvTranspose2d(k, stride, padding, output_padding, bias=False) -> LN.
    # Zero-dilation + edge pad (one lax.pad), then tap-fused stride-1 conv
    # with the spatially flipped, in/out-swapped kernel.
    I, O, kh, kw = (int(s) for s in w_iohw.shape)
    assert kh == kw
    k = kh
    N = int(x_flat.shape[0])
    x4 = x_flat.reshape(N, I, H, W)
    lo = k - 1 - padding
    hi = k - 1 - padding + output_padding
    xd = lax.pad(x4, jnp.array(0, x4.dtype),
                 ((0, 0, 0), (0, 0, 0),
                  (lo, hi, stride - 1), (lo, hi, stride - 1)))
    Hp = (H - 1) * stride + 1 + lo + hi
    Wp = (W - 1) * stride + 1 + lo + hi
    Ho, Wo = Hp - k + 1, Wp - k + 1
    xf = jnp.pad(xd.reshape(N, I, Hp * Wp), ((0, 0), (0, 0), (0, k - 1)))
    offsets = tuple(dh * Wp + dw for dh in range(k) for dw in range(k))
    wc = jnp.transpose(jnp.flip(w_iohw, axis=(2, 3)), (1, 0, 2, 3))  # OIHW
    w_taps = jnp.transpose(wc.reshape(O, I, k * k), (2, 0, 1))
    y_wide = _conv_ln(xf, w_taps.astype(jnp.bfloat16), offsets, Ho * Wp,
                      gamma, beta, eps=eps, relu_after_ln=relu)
    return _strip_wide(y_wide, O, Ho, Wp, Wo), Ho, Wo


def _dilate_for_1x1_deconv(x_flat, H, W, stride, output_padding):
    # Zero-dilated x at output resolution (feeds the fused shortcut GEMM).
    N, C, _ = (int(s) for s in x_flat.shape)
    x4 = x_flat.reshape(N, C, H, W)
    xd = lax.pad(x4, jnp.array(0, x4.dtype),
                 ((0, 0, 0), (0, 0, 0),
                  (0, output_padding, stride - 1),
                  (0, output_padding, stride - 1)))
    Ho = (H - 1) * stride + 1 + output_padding
    Wo = (W - 1) * stride + 1 + output_padding
    return xd.reshape(N, C, Ho * Wo), Ho, Wo


# ---------------------------------------------------------------------------
# DeconvBottleneck forward
# ---------------------------------------------------------------------------
def deconv_bottleneck_forward(x_nchw, p):
    eps = 1e-6
    N, in_c, H, W = (int(s) for s in x_nchw.shape)
    x = x_nchw.reshape(N, in_c, H * W).astype(jnp.bfloat16)   # flattened NCHW

    # conv1 (1x1) -> LN -> ReLU
    out = _conv1x1_ln(x, p["conv1_w"], p["n1_w"], p["n1_b"], relu=True, eps=eps)

    # conv2: 3x3 conv (stride 1) or 3x3 transposed conv (stride s)
    if p["stride"] == 1:
        out, Ho, Wo = _convkxk_ln(out, H, W, p["conv2_w"], 1,
                                  p["n2_w"], p["n2_b"], relu=True, eps=eps)
    else:
        out, Ho, Wo = _deconvkxk_ln(out, H, W, p["conv2_w"], p["stride"], 1, 1,
                                    p["n2_w"], p["n2_b"], relu=True, eps=eps)

    # Shortcut: identity, or upsample (1x1 conv / 1x1 deconv + LN) fused into
    # the conv3 kernel; general deconv upsample falls back to its own kernel.
    up = p["upsample"]
    if up is None:
        shortcut = ("add", x)
    elif up["type"] == "conv" and int(up["w"].shape[2]) == 1:
        wu = up["w"].reshape(int(up["w"].shape[0]), int(up["w"].shape[1]))
        shortcut = ("fused", x, wu, up["n_w"], up["n_b"])
    elif (up["type"] == "deconv" and int(up["w"].shape[2]) == 1
          and up["padding"] == 0):
        xs, Hs, Ws = _dilate_for_1x1_deconv(x, H, W, up["stride"],
                                            up["output_padding"])
        assert (Hs, Ws) == (Ho, Wo)
        wu = jnp.transpose(
            up["w"].reshape(int(up["w"].shape[0]), int(up["w"].shape[1])))
        shortcut = ("fused", xs, wu, up["n_w"], up["n_b"])
    else:
        sc, Hs, Ws = _deconvkxk_ln(x, H, W, up["w"], up["stride"],
                                   up["padding"], up["output_padding"],
                                   up["n_w"], up["n_b"], relu=False, eps=eps)
        assert (Hs, Ws) == (Ho, Wo)
        shortcut = ("add", sc)

    # conv3 (1x1) -> LN -> ReLU -> (+ shortcut) -> ReLU, all in ONE kernel.
    exp_c = int(p["conv3_w"].shape[0])
    out = _conv1x1_ln(out, p["conv3_w"], p["n3_w"], p["n3_b"], relu=True,
                      shortcut=shortcut, relu_after_add=True, eps=eps,
                      out_dtype=jnp.float32)
    return out.reshape(N, exp_c, Ho, Wo)


# ---------------------------------------------------------------------------
# Pure-JAX reference (same bf16 storage boundaries, f32 accumulation)
# ---------------------------------------------------------------------------
def _ln_ref(y, w, b, eps=1e-6):
    u = jnp.mean(y, axis=1, keepdims=True)
    s = jnp.mean((y - u) ** 2, axis=1, keepdims=True)
    return (y - u) * lax.rsqrt(s + eps) * w[None, :, None, None] \
        + b[None, :, None, None]


def _conv_ref(x, w_oihw, stride, padding):
    return lax.conv_general_dilated(
        x.astype(jnp.bfloat16), w_oihw.astype(jnp.bfloat16),
        (stride, stride), ((padding, padding), (padding, padding)),
        dimension_numbers=("NCHW", "OIHW", "NCHW"),
        preferred_element_type=jnp.float32)


def _deconv_ref(x, w_iohw, stride, padding, output_padding):
    k = int(w_iohw.shape[2])
    wc = jnp.transpose(jnp.flip(w_iohw, axis=(2, 3)), (1, 0, 2, 3))
    return lax.conv_general_dilated(
        x.astype(jnp.bfloat16), wc.astype(jnp.bfloat16), (1, 1),
        ((k - 1 - padding, k - 1 - padding + output_padding),) * 2,
        lhs_dilation=(stride, stride),
        dimension_numbers=("NCHW", "OIHW", "NCHW"),
        preferred_element_type=jnp.float32)


def deconv_bottleneck_reference(x_nchw, p):
    eps = 1e-6
    x = x_nchw.astype(jnp.bfloat16).astype(jnp.float32)

    def q(t):  # bf16 storage boundary between layers
        return t.astype(jnp.bfloat16).astype(jnp.float32)

    out = jax.nn.relu(_ln_ref(_conv_ref(x, p["conv1_w"], 1, 0),
                              p["n1_w"], p["n1_b"], eps))
    out = q(out)
    if p["stride"] == 1:
        out = jax.nn.relu(_ln_ref(_conv_ref(out, p["conv2_w"], 1, 1),
                                  p["n2_w"], p["n2_b"], eps))
    else:
        out = jax.nn.relu(_ln_ref(
            _deconv_ref(out, p["conv2_w"], p["stride"], 1, 1),
            p["n2_w"], p["n2_b"], eps))
    out = q(out)
    out = jax.nn.relu(_ln_ref(_conv_ref(out, p["conv3_w"], 1, 0),
                              p["n3_w"], p["n3_b"], eps))
    up = p["upsample"]
    if up is None:
        sc = x
    elif up["type"] == "conv":
        sc = _ln_ref(_conv_ref(x, up["w"], 1, 0), up["n_w"], up["n_b"], eps)
    else:
        sc = _ln_ref(_deconv_ref(x, up["w"], up["stride"], up["padding"],
                                 up["output_padding"]),
                     up["n_w"], up["n_b"], eps)
    return jax.nn.relu(out + sc)


# ---------------------------------------------------------------------------
# Deterministic synthetic parameters (no checkpoint loading)
# ---------------------------------------------------------------------------
def _conv_w(key, o, i, kh, kw):
    return jax.random.normal(key, (o, i, kh, kw), jnp.float32) / math.sqrt(i * kh * kw)


def _deconv_w(key, i, o, kh, kw):
    return jax.random.normal(key, (i, o, kh, kw), jnp.float32) / math.sqrt(i * kh * kw)


def _affine(key, c):
    k1, k2 = jax.random.split(key)
    return (1.0 + 0.1 * jax.random.normal(k1, (c,), jnp.float32),
            0.1 * jax.random.normal(k2, (c,), jnp.float32))


def make_params(key, in_c, out_c, expansion=2, stride=1):
    ks = list(jax.random.split(key, 10))
    exp_c = out_c * expansion
    n1 = _affine(ks[1], out_c)
    n2 = _affine(ks[3], out_c)
    n3 = _affine(ks[5], exp_c)
    p = {
        "stride": stride,
        "conv1_w": _conv_w(ks[0], out_c, in_c, 1, 1),
        "n1_w": n1[0], "n1_b": n1[1],
        "conv2_w": (_conv_w(ks[2], out_c, out_c, 3, 3) if stride == 1
                    else _deconv_w(ks[2], out_c, out_c, 3, 3)),   # IOHW if deconv
        "n2_w": n2[0], "n2_b": n2[1],
        "conv3_w": _conv_w(ks[4], exp_c, out_c, 1, 1),
        "n3_w": n3[0], "n3_b": n3[1],
    }
    if stride != 1:
        nu = _affine(ks[7], exp_c)
        p["upsample"] = {"type": "deconv",
                         "w": _deconv_w(ks[6], in_c, exp_c, 1, 1),
                         "stride": stride, "padding": 0,
                         "output_padding": stride - 1,
                         "n_w": nu[0], "n_b": nu[1]}
    elif in_c != exp_c:
        nu = _affine(ks[7], exp_c)
        p["upsample"] = {"type": "conv",
                         "w": _conv_w(ks[6], exp_c, in_c, 1, 1),
                         "n_w": nu[0], "n_b": nu[1]}
    else:
        p["upsample"] = None
    return p


if __name__ == "__main__":
    root = jax.random.PRNGKey(0)
    kx1, kx2, kx3, kp1, kp2, kp3 = jax.random.split(root, 6)

    configs = [
        # stride=1, identity shortcut (in_c == out_c * expansion)
        ("stride1_identity",
         jax.random.normal(kx1, (2, 8, 16, 16), jnp.float32),
         make_params(kp1, in_c=8, out_c=4, expansion=2, stride=1)),
        # stride=1, 1x1-conv upsample fused into conv3 (in_c != exp_c)
        ("stride1_projection",
         jax.random.normal(kx2, (2, 6, 16, 16), jnp.float32),
         make_params(kp2, in_c=6, out_c=4, expansion=2, stride=1)),
        # stride=2 "deconv" bottleneck (ConvTranspose2d) + 1x1-deconv upsample
        ("stride2_deconv",
         jax.random.normal(kx3, (2, 8, 16, 16), jnp.float32),
         make_params(kp3, in_c=8, out_c=4, expansion=2, stride=2)),
    ]

    for name, x, params in configs:
        fwd = jax.jit(lambda a, p=params: deconv_bottleneck_forward(a, p))
        ref = jax.jit(lambda a, p=params: deconv_bottleneck_reference(a, p))
        y = fwd(x)
        y_ref = ref(x)
        jax.block_until_ready((y, y_ref))
        assert y.shape == y_ref.shape and y.dtype == jnp.float32, \
            (name, y.shape, y_ref.shape)
        assert bool(jnp.all(jnp.isfinite(y))), name
        err = float(jnp.max(jnp.abs(y - y_ref)))
        assert err < 2e-2, (name, err)
    print("KERNEL_OK")
</pallas_src>

<mosaic_0001>
module attributes {stable_mosaic.version = 11 : i64} {
  func.func @_conv_ln_kernel(%arg0: i32, %arg1: i32, %arg2: memref<1x8x256xbf16, #tpu.memory_space<vmem>>, %arg3: memref<1x4x8xbf16, #tpu.memory_space<vmem>>, %arg4: memref<4x1xf32, #tpu.memory_space<vmem>>, %arg5: memref<4x1xf32, #tpu.memory_space<vmem>>, %arg6: memref<1x4x256xbf16, #tpu.memory_space<vmem>>) attributes {dimension_semantics = [#tpu.dimension_semantics<parallel>, #tpu.dimension_semantics<parallel>], iteration_bounds = array<i64: 2, 1>, scalar_prefetch = 0 : i64, scratch_operands = 0 : i64, tpu.core_type = #tpu.core_type<tc>, window_params = [{transform_indices = @transform_0, window_bounds = array<i64: 1, 8, 256>}, {pipeline_mode = #tpu.pipeline_mode<synchronous>, transform_indices = @transform_1, window_bounds = array<i64: 1, 4, 8>}, {pipeline_mode = #tpu.pipeline_mode<synchronous>, transform_indices = @transform_2, window_bounds = array<i64: 4, 1>}, {pipeline_mode = #tpu.pipeline_mode<synchronous>, transform_indices = @transform_3, window_bounds = array<i64: 4, 1>}, {transform_indices = @transform_4, window_bounds = array<i64: 1, 4, 256>}]} {
    %c0 = arith.constant 0 : index
    %c0_0 = arith.constant 0 : index
    %c0_1 = arith.constant 0 : index
    %0 = vector.load %arg3[%c0, %c0_0, %c0_1] : memref<1x4x8xbf16, #tpu.memory_space<vmem>>, vector<1x4x8xbf16>
    %1 = vector.shape_cast %0 : vector<1x4x8xbf16> to vector<4x8xbf16>
    %c0_2 = arith.constant 0 : index
    %c0_3 = arith.constant 0 : index
    %c0_4 = arith.constant 0 : index
    %2 = vector.load %arg2[%c0_2, %c0_3, %c0_4] : memref<1x8x256xbf16, #tpu.memory_space<vmem>>, vector<1x8x256xbf16>
    %3 = vector.shape_cast %2 : vector<1x8x256xbf16> to vector<8x256xbf16>
    %cst = arith.constant dense<0.000000e+00> : vector<4x256xf32>
    %4 = tpu.matmul %1, %3, %cst {dimension_numbers = #tpu.dot_dimension_numbers<[1], [0], [0], [1], [0, 0, 1, 1], [], []>} : vector<4x8xbf16>, vector<8x256xbf16>, vector<4x256xf32> -> vector<4x256xf32>
    %cst_5 = arith.constant dense<0.000000e+00> : vector<256xf32>
    %5 = vector.multi_reduction <add>, %4, %cst_5 [0] : vector<4x256xf32> to vector<256xf32>
    %6 = vector.shape_cast %5 : vector<256xf32> to vector<1x256xf32>
    %cst_6 = arith.constant 2.500000e-01 : f32
    %7 = vector.broadcast %cst_6 : f32 to vector<1x256xf32>
    %8 = arith.mulf %6, %7 : vector<1x256xf32>
    %9 = vector.broadcast %8 : vector<1x256xf32> to vector<4x256xf32>
    %10 = arith.subf %4, %9 : vector<4x256xf32>
    %11 = arith.mulf %10, %10 : vector<4x256xf32>
    %cst_7 = arith.constant dense<0.000000e+00> : vector<256xf32>
    %12 = vector.multi_reduction <add>, %11, %cst_7 [0] : vector<4x256xf32> to vector<256xf32>
    %13 = vector.shape_cast %12 : vector<256xf32> to vector<1x256xf32>
    %cst_8 = arith.constant 2.500000e-01 : f32
    %14 = vector.broadcast %cst_8 : f32 to vector<1x256xf32>
    %15 = arith.mulf %13, %14 : vector<1x256xf32>
    %cst_9 = arith.constant 9.99999997E-7 : f32
    %16 = vector.broadcast %cst_9 : f32 to vector<1x256xf32>
    %17 = arith.addf %15, %16 : vector<1x256xf32>
    %18 = math.rsqrt %17 : vector<1x256xf32>
    %19 = vector.broadcast %18 : vector<1x256xf32> to vector<4x256xf32>
    %20 = arith.mulf %10, %19 : vector<4x256xf32>
    %c0_10 = arith.constant 0 : index
    %c0_11 = arith.constant 0 : index
    %21 = vector.load %arg4[%c0_10, %c0_11] : memref<4x1xf32, #tpu.memory_space<vmem>>, vector<4x1xf32>
    %22 = vector.broadcast %21 : vector<4x1xf32> to vector<4x256xf32>
    %23 = arith.mulf %20, %22 : vector<4x256xf32>
    %c0_12 = arith.constant 0 : index
    %c0_13 = arith.constant 0 : index
    %24 = vector.load %arg5[%c0_12, %c0_13] : memref<4x1xf32, #tpu.memory_space<vmem>>, vector<4x1xf32>
    %25 = vector.broadcast %24 : vector<4x1xf32> to vector<4x256xf32>
    %26 = arith.addf %23, %25 : vector<4x256xf32>
    %cst_14 = arith.constant 0.000000e+00 : f32
    %27 = vector.broadcast %cst_14 : f32 to vector<4x256xf32>
    %28 = arith.maximumf %26, %27 : vector<4x256xf32>
    %29 = arith.truncf %28 : vector<4x256xf32> to vector<4x256xbf16>
    %c0_15 = arith.constant 0 : index
    %c0_16 = arith.constant 0 : index
    %c0_17 = arith.constant 0 : index
    %30 = vector.load %arg6[%c0_15, %c0_16, %c0_17] : memref<1x4x256xbf16, #tpu.memory_space<vmem>>, vector<1x4x256xbf16>
    %31 = vector.shape_cast %30 : vector<1x4x256xbf16> to vector<4x256xbf16>
    %32 = vector.shape_cast %29 : vector<4x256xbf16> to vector<1x4x256xbf16>
    tpu.vector_store %arg6[%c0_15, %c0_16, %c0_17], %32 {strides = array<i32>} : memref<1x4x256xbf16, #tpu.memory_space<vmem>>, vector<1x4x256xbf16>,
    return
  }
  func.func @transform_0(%arg0: i32, %arg1: i32) -> (i32, i32, i32) {
    %c0_i32 = arith.constant 0 : i32
    %c0_i32_0 = arith.constant 0 : i32
    return %arg0, %c0_i32, %arg1 : i32, i32, i32
  }
  func.func @transform_1(%arg0: i32, %arg1: i32) -> (i32, i32, i32) {
    %c0_i32 = arith.constant 0 : i32
    %c0_i32_0 = arith.constant 0 : i32
    %c0_i32_1 = arith.constant 0 : i32
    %c0_i32_2 = arith.constant 0 : i32
    return %c0_i32, %c0_i32_0, %c0_i32_1 : i32, i32, i32
  }
  func.func @transform_2(%arg0: i32, %arg1: i32) -> (i32, i32) {
    %c0_i32 = arith.constant 0 : i32
    %c0_i32_0 = arith.constant 0 : i32
    %c0_i32_1 = arith.constant 0 : i32
    return %c0_i32, %c0_i32_0 : i32, i32
  }
  func.func @transform_3(%arg0: i32, %arg1: i32) -> (i32, i32) {
    %c0_i32 = arith.constant 0 : i32
    %c0_i32_0 = arith.constant 0 : i32
    %c0_i32_1 = arith.constant 0 : i32
    return %c0_i32, %c0_i32_0 : i32, i32
  }
  func.func @transform_4(%arg0: i32, %arg1: i32) -> (i32, i32, i32) {
    %c0_i32 = arith.constant 0 : i32
    %c0_i32_0 = arith.constant 0 : i32
    return %arg0, %c0_i32, %arg1 : i32, i32, i32
  }
}

module attributes {stable_mosaic.version = 11 : i64} {
  func.func @_conv_ln_kernel(%arg0: i32, %arg1: i32, %arg2: memref<1x4x326xbf16, #tpu.memory_space<vmem>>, %arg3: memref<9x4x4xbf16, #tpu.memory_space<vmem>>, %arg4: memref<4x1xf32, #tpu.memory_space<vmem>>, %arg5: memref<4x1xf32, #tpu.memory_space<vmem>>, %arg6: memref<1x4x288xbf16, #tpu.memory_space<vmem>>) attributes {dimension_semantics = [#tpu.dimension_semantics<parallel>, #tpu.dimension_semantics<parallel>], iteration_bounds = array<i64: 2, 1>, scalar_prefetch = 0 : i64, scratch_operands = 0 : i64, tpu.core_type = #tpu.core_type<tc>, window_params = [{transform_indices = @transform_0, window_bounds = array<i64: 1, 4, 326>}, {pipeline_mode = #tpu.pipeline_mode<synchronous>, transform_indices = @transform_1, window_bounds = array<i64: 9, 4, 4>}, {pipeline_mode = #tpu.pipeline_mode<synchronous>, transform_indices = @transform_2, window_bounds = array<i64: 4, 1>}, {pipeline_mode = #tpu.pipeline_mode<synchronous>, transform_indices = @transform_3, window_bounds = array<i64: 4, 1>}, {transform_indices = @transform_4, window_bounds = array<i64: 1, 4, 288>}]} {
    %c0 = arith.constant 0 : index
    %c0_0 = arith.constant 0 : index
    %c0_1 = arith.constant 0 : index
    %0 = vector.load %arg3[%c0, %c0_0, %c0_1] : memref<9x4x4xbf16, #tpu.memory_space<vmem>>, vector<1x4x4xbf16>
    %1 = vector.shape_cast %0 : vector<1x4x4xbf16> to vector<4x4xbf16>
    %c0_2 = arith.constant 0 : index
    %c0_3 = arith.constant 0 : index
    %c0_4 = arith.constant 0 : index
    %2 = vector.load %arg2[%c0_2, %c0_3, %c0_4] : memref<1x4x326xbf16, #tpu.memory_space<vmem>>, vector<1x4x288xbf16>
    %3 = vector.shape_cast %2 : vector<1x4x288xbf16> to vector<4x288xbf16>
    %cst = arith.constant dense<0.000000e+00> : vector<4x288xf32>
    %4 = tpu.matmul %1, %3, %cst {dimension_numbers = #tpu.dot_dimension_numbers<[1], [0], [0], [1], [0, 0, 1, 1], [], []>} : vector<4x4xbf16>, vector<4x288xbf16>, vector<4x288xf32> -> vector<4x288xf32>
    %c1 = arith.constant 1 : index
    %c0_5 = arith.constant 0 : index
    %c0_6 = arith.constant 0 : index
    %5 = vector.load %arg3[%c1, %c0_5, %c0_6] : memref<9x4x4xbf16, #tpu.memory_space<vmem>>, vector<1x4x4xbf16>
    %6 = vector.shape_cast %5 : vector<1x4x4xbf16> to vector<4x4xbf16>
    %c0_7 = arith.constant 0 : index
    %c0_8 = arith.constant 0 : index
    %c1_9 = arith.constant 1 : index
    %7 = vector.load %arg2[%c0_7, %c0_8, %c1_9] : memref<1x4x326xbf16, #tpu.memory_space<vmem>>, vector<1x4x288xbf16>
    %8 = vector.shape_cast %7 : vector<1x4x288xbf16> to vector<4x288xbf16>
    %cst_10 = arith.constant dense<0.000000e+00> : vector<4x288xf32>
    %9 = tpu.matmul %6, %8, %cst_10 {dimension_numbers = #tpu.dot_dimension_numbers<[1], [0], [0], [1], [0, 0, 1, 1], [], []>} : vector<4x4xbf16>, vector<4x288xbf16>, vector<4x288xf32> -> vector<4x288xf32>
    %10 = arith.addf %4, %9 : vector<4x288xf32>
    %c2 = arith.constant 2 : index
    %c0_11 = arith.constant 0 : index
    %c0_12 = arith.constant 0 : index
    %11 = vector.load %arg3[%c2, %c0_11, %c0_12] : memref<9x4x4xbf16, #tpu.memory_space<vmem>>, vector<1x4x4xbf16>
    %12 = vector.shape_cast %11 : vector<1x4x4xbf16> to vector<4x4xbf16>
    %c0_13 = arith.constant 0 : index
    %c0_14 = arith.constant 0 : index
    %c2_15 = arith.constant 2 : index
    %13 = vector.load %arg2[%c0_13, %c0_14, %c2_15] : memref<1x4x326xbf16, #tpu.memory_space<vmem>>, vector<1x4x288xbf16>
    %14 = vector.shape_cast %13 : vector<1x4x288xbf16> to vector<4x288xbf16>
    %cst_16 = arith.constant dense<0.000000e+00> : vector<4x288xf32>
    %15 = tpu.matmul %12, %14, %cst_16 {dimension_numbers = #tpu.dot_dimension_numbers<[1], [0], [0], [1], [0, 0, 1, 1], [], []>} : vector<4x4xbf16>, vector<4x288xbf16>, vector<4x288xf32> -> vector<4x288xf32>
    %16 = arith.addf %10, %15 : vector<4x288xf32>
    %c3 = arith.constant 3 : index
    %c0_17 = arith.constant 0 : index
    %c0_18 = arith.constant 0 : index
    %17 = vector.load %arg3[%c3, %c0_17, %c0_18] : memref<9x4x4xbf16, #tpu.memory_space<vmem>>, vector<1x4x4xbf16>
    %18 = vector.shape_cast %17 : vector<1x4x4xbf16> to vector<4x4xbf16>
    %c0_19 = arith.constant 0 : index
    %c0_20 = arith.constant 0 : index
    %c18 = arith.constant 18 : index
    %19 = vector.load %arg2[%c0_19, %c0_20, %c18] : memref<1x4x326xbf16, #tpu.memory_space<vmem>>, vector<1x4x288xbf16>
    %20 = vector.shape_cast %19 : vector<1x4x288xbf16> to vector<4x288xbf16>
    %cst_21 = arith.constant dense<0.000000e+00> : vector<4x288xf32>
    %21 = tpu.matmul %18, %20, %cst_21 {dimension_numbers = #tpu.dot_dimension_numbers<[1], [0], [0], [1], [0, 0, 1, 1], [], []>} : vector<4x4xbf16>, vector<4x288xbf16>, vector<4x288xf32> -> vector<4x288xf32>
    %22 = arith.addf %16, %21 : vector<4x288xf32>
    %c4 = arith.constant 4 : index
    %c0_22 = arith.constant 0 : index
    %c0_23 = arith.constant 0 : index
    %23 = vector.load %arg3[%c4, %c0_22, %c0_23] : memref<9x4x4xbf16, #tpu.memory_space<vmem>>, vector<1x4x4xbf16>
    %24 = vector.shape_cast %23 : vector<1x4x4xbf16> to vector<4x4xbf16>
    %c0_24 = arith.constant 0 : index
    %c0_25 = arith.constant 0 : index
    %c19 = arith.constant 19 : index
    %25 = vector.load %arg2[%c0_24, %c0_25, %c19] : memref<1x4x326xbf16, #tpu.memory_space<vmem>>, vector<1x4x288xbf16>
    %26 = vector.shape_cast %25 : vector<1x4x288xbf16> to vector<4x288xbf16>
    %cst_26 = arith.constant dense<0.000000e+00> : vector<4x288xf32>
    %27 = tpu.matmul %24, %26, %cst_26 {dimension_numbers = #tpu.dot_dimension_numbers<[1], [0], [0], [1], [0, 0, 1, 1], [], []>} : vector<4x4xbf16>, vector<4x288xbf16>, vector<4x288xf32> -> vector<4x288xf32>
    %28 = arith.addf %22, %27 : vector<4x288xf32>
    %c5 = arith.constant 5 : index
    %c0_27 = arith.constant 0 : index
    %c0_28 = arith.constant 0 : index
    %29 = vector.load %arg3[%c5, %c0_27, %c0_28] : memref<9x4x4xbf16, #tpu.memory_space<vmem>>, vector<1x4x4xbf16>
    %30 = vector.shape_cast %29 : vector<1x4x4xbf16> to vector<4x4xbf16>
    %c0_29 = arith.constant 0 : index
    %c0_30 = arith.constant 0 : index
    %c20 = arith.constant 20 : index
    %31 = vector.load %arg2[%c0_29, %c0_30, %c20] : memref<1x4x326xbf16, #tpu.memory_space<vmem>>, vector<1x4x288xbf16>
    %32 = vector.shape_cast %31 : vector<1x4x288xbf16> to vector<4x288xbf16>
    %cst_31 = arith.constant dense<0.000000e+00> : vector<4x288xf32>
    %33 = tpu.matmul %30, %32, %cst_31 {dimension_numbers = #tpu.dot_dimension_numbers<[1], [0], [0], [1], [0, 0, 1, 1], [], []>} : vector<4x4xbf16>, vector<4x288xbf16>, vector<4x288xf32> -> vector<4x288xf32>
    %34 = arith.addf %28, %33 : vector<4x288xf32>
    %c6 = arith.constant 6 : index
    %c0_32 = arith.constant 0 : index
    %c0_33 = arith.constant 0 : index
    %35 = vector.load %arg3[%c6, %c0_32, %c0_33] : memref<9x4x4xbf16, #tpu.memory_space<vmem>>, vector<1x4x4xbf16>
    %36 = vector.shape_cast %35 : vector<1x4x4xbf16> to vector<4x4xbf16>
    %c0_34 = arith.constant 0 : index
    %c0_35 = arith.constant 0 : index
    %c36 = arith.constant 36 : index
    %37 = vector.load %arg2[%c0_34, %c0_35, %c36] : memref<1x4x326xbf16, #tpu.memory_space<vmem>>, vector<1x4x288xbf16>
    %38 = vector.shape_cast %37 : vector<1x4x288xbf16> to vector<4x288xbf16>
    %cst_36 = arith.constant dense<0.000000e+00> : vector<4x288xf32>
    %39 = tpu.matmul %36, %38, %cst_36 {dimension_numbers = #tpu.dot_dimension_numbers<[1], [0], [0], [1], [0, 0, 1, 1], [], []>} : vector<4x4xbf16>, vector<4x288xbf16>, vector<4x288xf32> -> vector<4x288xf32>
    %40 = arith.addf %34, %39 : vector<4x288xf32>
    %c7 = arith.constant 7 : index
    %c0_37 = arith.constant 0 : index
    %c0_38 = arith.constant 0 : index
    %41 = vector.load %arg3[%c7, %c0_37, %c0_38] : memref<9x4x4xbf16, #tpu.memory_space<vmem>>, vector<1x4x4xbf16>
    %42 = vector.shape_cast %41 : vector<1x4x4xbf16> to vector<4x4xbf16>
    %c0_39 = arith.constant 0 : index
    %c0_40 = arith.constant 0 : index
    %c37 = arith.constant 37 : index
    %43 = vector.load %arg2[%c0_39, %c0_40, %c37] : memref<1x4x326xbf16, #tpu.memory_space<vmem>>, vector<1x4x288xbf16>
    %44 = vector.shape_cast %43 : vector<1x4x288xbf16> to vector<4x288xbf16>
    %cst_41 = arith.constant dense<0.000000e+00> : vector<4x288xf32>
    %45 = tpu.matmul %42, %44, %cst_41 {dimension_numbers = #tpu.dot_dimension_numbers<[1], [0], [0], [1], [0, 0, 1, 1], [], []>} : vector<4x4xbf16>, vector<4x288xbf16>, vector<4x288xf32> -> vector<4x288xf32>
    %46 = arith.addf %40, %45 : vector<4x288xf32>
    %c8 = arith.constant 8 : index
    %c0_42 = arith.constant 0 : index
    %c0_43 = arith.constant 0 : index
    %47 = vector.load %arg3[%c8, %c0_42, %c0_43] : memref<9x4x4xbf16, #tpu.memory_space<vmem>>, vector<1x4x4xbf16>
    %48 = vector.shape_cast %47 : vector<1x4x4xbf16> to vector<4x4xbf16>
    %c0_44 = arith.constant 0 : index
    %c0_45 = arith.constant 0 : index
    %c38 = arith.constant 38 : index
    %49 = vector.load %arg2[%c0_44, %c0_45, %c38] : memref<1x4x326xbf16, #tpu.memory_space<vmem>>, vector<1x4x288xbf16>
    %50 = vector.shape_cast %49 : vector<1x4x288xbf16> to vector<4x288xbf16>
    %cst_46 = arith.constant dense<0.000000e+00> : vector<4x288xf32>
    %51 = tpu.matmul %48, %50, %cst_46 {dimension_numbers = #tpu.dot_dimension_numbers<[1], [0], [0], [1], [0, 0, 1, 1], [], []>} : vector<4x4xbf16>, vector<4x288xbf16>, vector<4x288xf32> -> vector<4x288xf32>
    %52 = arith.addf %46, %51 : vector<4x288xf32>
    %cst_47 = arith.constant dense<0.000000e+00> : vector<288xf32>
    %53 = vector.multi_reduction <add>, %52, %cst_47 [0] : vector<4x288xf32> to vector<288xf32>
    %54 = vector.shape_cast %53 : vector<288xf32> to vector<1x288xf32>
    %cst_48 = arith.constant 2.500000e-01 : f32
    %55 = vector.broadcast %cst_48 : f32 to vector<1x288xf32>
    %56 = arith.mulf %54, %55 : vector<1x288xf32>
    %57 = vector.broadcast %56 : vector<1x288xf32> to vector<4x288xf32>
    %58 = arith.subf %52, %57 : vector<4x288xf32>
    %59 = arith.mulf %58, %58 : vector<4x288xf32>
    %cst_49 = arith.constant dense<0.000000e+00> : vector<288xf32>
    %60 = vector.multi_reduction <add>, %59, %cst_49 [0] : vector<4x288xf32> to vector<288xf32>
    %61 = vector.shape_cast %60 : vector<288xf32> to vector<1x288xf32>
    %cst_50 = arith.constant 2.500000e-01 : f32
    %62 = vector.broadcast %cst_50 : f32 to vector<1x288xf32>
    %63 = arith.mulf %61, %62 : vector<1x288xf32>
    %cst_51 = arith.constant 9.99999997E-7 : f32
    %64 = vector.broadcast %cst_51 : f32 to vector<1x288xf32>
    %65 = arith.addf %63, %64 : vector<1x288xf32>
    %66 = math.rsqrt %65 : vector<1x288xf32>
    %67 = vector.broadcast %66 : vector<1x288xf32> to vector<4x288xf32>
    %68 = arith.mulf %58, %67 : vector<4x288xf32>
    %c0_52 = arith.constant 0 : index
    %c0_53 = arith.constant 0 : index
    %69 = vector.load %arg4[%c0_52, %c0_53] : memref<4x1xf32, #tpu.memory_space<vmem>>, vector<4x1xf32>
    %70 = vector.broadcast %69 : vector<4x1xf32> to vector<4x288xf32>
    %71 = arith.mulf %68, %70 : vector<4x288xf32>
    %c0_54 = arith.constant 0 : index
    %c0_55 = arith.constant 0 : index
    %72 = vector.load %arg5[%c0_54, %c0_55] : memref<4x1xf32, #tpu.memory_space<vmem>>, vector<4x1xf32>
    %73 = vector.broadcast %72 : vector<4x1xf32> to vector<4x288xf32>
    %74 = arith.addf %71, %73 : vector<4x288xf32>
    %cst_56 = arith.constant 0.000000e+00 : f32
    %75 = vector.broadcast %cst_56 : f32 to vector<4x288xf32>
    %76 = arith.maximumf %74, %75 : vector<4x288xf32>
    %77 = arith.truncf %76 : vector<4x288xf32> to vector<4x288xbf16>
    %c0_57 = arith.constant 0 : index
    %c0_58 = arith.constant 0 : index
    %c0_59 = arith.constant 0 : index
    %78 = vector.load %arg6[%c0_57, %c0_58, %c0_59] : memref<1x4x288xbf16, #tpu.memory_space<vmem>>, vector<1x4x288xbf16>
    %79 = vector.shape_cast %78 : vector<1x4x288xbf16> to vector<4x288xbf16>
    %80 = vector.shape_cast %77 : vector<4x288xbf16> to vector<1x4x288xbf16>
    tpu.vector_store %arg6[%c0_57, %c0_58, %c0_59], %80 {strides = array<i32>} : memref<1x4x288xbf16, #tpu.memory_space<vmem>>, vector<1x4x288xbf16>,
    return
  }
  func.func @transform_0(%arg0: i32, %arg1: i32) -> (i32, i32, i32) {
    %c0_i32 = arith.constant 0 : i32
    %c0_i32_0 = arith.constant 0 : i32
    return %arg0, %c0_i32, %arg1 : i32, i32, i32
  }
  func.func @transform_1(%arg0: i32, %arg1: i32) -> (i32, i32, i32) {
    %c0_i32 = arith.constant 0 : i32
    %c0_i32_0 = arith.constant 0 : i32
    %c0_i32_1 = arith.constant 0 : i32
    %c0_i32_2 = arith.constant 0 : i32
    return %c0_i32, %c0_i32_0, %c0_i32_1 : i32, i32, i32
  }
  func.func @transform_2(%arg0: i32, %arg1: i32) -> (i32, i32) {
    %c0_i32 = arith.constant 0 : i32
    %c0_i32_0 = arith.constant 0 : i32
    %c0_i32_1 = arith.constant 0 : i32
    return %c0_i32, %c0_i32_0 : i32, i32
  }
  func.func @transform_3(%arg0: i32, %arg1: i32) -> (i32, i32) {
    %c0_i32 = arith.constant 0 : i32
    %c0_i32_0 = arith.constant 0 : i32
    %c0_i32_1 = arith.constant 0 : i32
    return %c0_i32, %c0_i32_0 : i32, i32
  }
  func.func @transform_4(%arg0: i32, %arg1: i32) -> (i32, i32, i32) {
    %c0_i32 = arith.constant 0 : i32
    %c0_i32_0 = arith.constant 0 : i32
    return %arg0, %c0_i32, %arg1 : i32, i32, i32
  }
}

module attributes {stable_mosaic.version = 11 : i64} {
  func.func @_conv_ln_kernel(%arg0: i32, %arg1: i32, %arg2: memref<1x4x256xbf16, #tpu.memory_space<vmem>>, %arg3: memref<1x8x4xbf16, #tpu.memory_space<vmem>>, %arg4: memref<8x1xf32, #tpu.memory_space<vmem>>, %arg5: memref<8x1xf32, #tpu.memory_space<vmem>>, %arg6: memref<1x8x256xbf16, #tpu.memory_space<vmem>>, %arg7: memref<1x8x256xf32, #tpu.memory_space<vmem>>) attributes {dimension_semantics = [#tpu.dimension_semantics<parallel>, #tpu.dimension_semantics<parallel>], iteration_bounds = array<i64: 2, 1>, scalar_prefetch = 0 : i64, scratch_operands = 0 : i64, tpu.core_type = #tpu.core_type<tc>, window_params = [{transform_indices = @transform_0, window_bounds = array<i64: 1, 4, 256>}, {pipeline_mode = #tpu.pipeline_mode<synchronous>, transform_indices = @transform_1, window_bounds = array<i64: 1, 8, 4>}, {pipeline_mode = #tpu.pipeline_mode<synchronous>, transform_indices = @transform_2, window_bounds = array<i64: 8, 1>}, {pipeline_mode = #tpu.pipeline_mode<synchronous>, transform_indices = @transform_3, window_bounds = array<i64: 8, 1>}, {transform_indices = @transform_4, window_bounds = array<i64: 1, 8, 256>}, {transform_indices = @transform_5, window_bounds = array<i64: 1, 8, 256>}]} {
    %c0 = arith.constant 0 : index
    %c0_0 = arith.constant 0 : index
    %c0_1 = arith.constant 0 : index
    %0 = vector.load %arg3[%c0, %c0_0, %c0_1] : memref<1x8x4xbf16, #tpu.memory_space<vmem>>, vector<1x8x4xbf16>
    %1 = vector.shape_cast %0 : vector<1x8x4xbf16> to vector<8x4xbf16>
    %c0_2 = arith.constant 0 : index
    %c0_3 = arith.constant 0 : index
    %c0_4 = arith.constant 0 : index
    %2 = vector.load %arg2[%c0_2, %c0_3, %c0_4] : memref<1x4x256xbf16, #tpu.memory_space<vmem>>, vector<1x4x256xbf16>
    %3 = vector.shape_cast %2 : vector<1x4x256xbf16> to vector<4x256xbf16>
    %cst = arith.constant dense<0.000000e+00> : vector<8x256xf32>
    %4 = tpu.matmul %1, %3, %cst {dimension_numbers = #tpu.dot_dimension_numbers<[1], [0], [0], [1], [0, 0, 1, 1], [], []>} : vector<8x4xbf16>, vector<4x256xbf16>, vector<8x256xf32> -> vector<8x256xf32>
    %cst_5 = arith.constant dense<0.000000e+00> : vector<256xf32>
    %5 = vector.multi_reduction <add>, %4, %cst_5 [0] : vector<8x256xf32> to vector<256xf32>
    %6 = vector.shape_cast %5 : vector<256xf32> to vector<1x256xf32>
    %cst_6 = arith.constant 1.250000e-01 : f32
    %7 = vector.broadcast %cst_6 : f32 to vector<1x256xf32>
    %8 = arith.mulf %6, %7 : vector<1x256xf32>
    %9 = vector.broadcast %8 : vector<1x256xf32> to vector<8x256xf32>
    %10 = arith.subf %4, %9 : vector<8x256xf32>
    %11 = arith.mulf %10, %10 : vector<8x256xf32>
    %cst_7 = arith.constant dense<0.000000e+00> : vector<256xf32>
    %12 = vector.multi_reduction <add>, %11, %cst_7 [0] : vector<8x256xf32> to vector<256xf32>
    %13 = vector.shape_cast %12 : vector<256xf32> to vector<1x256xf32>
    %cst_8 = arith.constant 1.250000e-01 : f32
    %14 = vector.broadcast %cst_8 : f32 to vector<1x256xf32>
    %15 = arith.mulf %13, %14 : vector<1x256xf32>
    %cst_9 = arith.constant 9.99999997E-7 : f32
    %16 = vector.broadcast %cst_9 : f32 to vector<1x256xf32>
    %17 = arith.addf %15, %16 : vector<1x256xf32>
    %18 = math.rsqrt %17 : vector<1x256xf32>
    %19 = vector.broadcast %18 : vector<1x256xf32> to vector<8x256xf32>
    %20 = arith.mulf %10, %19 : vector<8x256xf32>
    %c0_10 = arith.constant 0 : index
    %c0_11 = arith.constant 0 : index
    %21 = vector.load %arg4[%c0_10, %c0_11] : memref<8x1xf32, #tpu.memory_space<vmem>>, vector<8x1xf32>
    %22 = vector.broadcast %21 : vector<8x1xf32> to vector<8x256xf32>
    %23 = arith.mulf %20, %22 : vector<8x256xf32>
    %c0_12 = arith.constant 0 : index
    %c0_13 = arith.constant 0 : index
    %24 = vector.load %arg5[%c0_12, %c0_13] : memref<8x1xf32, #tpu.memory_space<vmem>>, vector<8x1xf32>
    %25 = vector.broadcast %24 : vector<8x1xf32> to vector<8x256xf32>
    %26 = arith.addf %23, %25 : vector<8x256xf32>
    %cst_14 = arith.constant 0.000000e+00 : f32
    %27 = vector.broadcast %cst_14 : f32 to vector<8x256xf32>
    %28 = arith.maximumf %26, %27 : vector<8x256xf32>
    %c0_15 = arith.constant 0 : index
    %c0_16 = arith.constant 0 : index
    %c0_17 = arith.constant 0 : index
    %29 = vector.load %arg6[%c0_15, %c0_16, %c0_17] : memref<1x8x256xbf16, #tpu.memory_space<vmem>>, vector<1x8x256xbf16>
    %30 = vector.shape_cast %29 : vector<1x8x256xbf16> to vector<8x256xbf16>
    %31 = arith.extf %30 : vector<8x256xbf16> to vector<8x256xf32>
    %32 = arith.addf %28, %31 : vector<8x256xf32>
    %cst_18 = arith.constant 0.000000e+00 : f32
    %33 = vector.broadcast %cst_18 : f32 to vector<8x256xf32>
    %34 = arith.maximumf %32, %33 : vector<8x256xf32>
    %c0_19 = arith.constant 0 : index
    %c0_20 = arith.constant 0 : index
    %c0_21 = arith.constant 0 : index
    %35 = vector.load %arg7[%c0_19, %c0_20, %c0_21] : memref<1x8x256xf32, #tpu.memory_space<vmem>>, vector<1x8x256xf32>
    %36 = vector.shape_cast %35 : vector<1x8x256xf32> to vector<8x256xf32>
    %37 = vector.shape_cast %34 : vector<8x256xf32> to vector<1x8x256xf32>
    tpu.vector_store %arg7[%c0_19, %c0_20, %c0_21], %37 {strides = array<i32>} : memref<1x8x256xf32, #tpu.memory_space<vmem>>, vector<1x8x256xf32>,
    return
  }
  func.func @transform_0(%arg0: i32, %arg1: i32) -> (i32, i32, i32) {
    %c0_i32 = arith.constant 0 : i32
    %c0_i32_0 = arith.constant 0 : i32
    return %arg0, %c0_i32, %arg1 : i32, i32, i32
  }
  func.func @transform_1(%arg0: i32, %arg1: i32) -> (i32, i32, i32) {
    %c0_i32 = arith.constant 0 : i32
    %c0_i32_0 = arith.constant 0 : i32
    %c0_i32_1 = arith.constant 0 : i32
    %c0_i32_2 = arith.constant 0 : i32
    return %c0_i32, %c0_i32_0, %c0_i32_1 : i32, i32, i32
  }
  func.func @transform_2(%arg0: i32, %arg1: i32) -> (i32, i32) {
    %c0_i32 = arith.constant 0 : i32
    %c0_i32_0 = arith.constant 0 : i32
    %c0_i32_1 = arith.constant 0 : i32
    return %c0_i32, %c0_i32_0 : i32, i32
  }
  func.func @transform_3(%arg0: i32, %arg1: i32) -> (i32, i32) {
    %c0_i32 = arith.constant 0 : i32
    %c0_i32_0 = arith.constant 0 : i32
    %c0_i32_1 = arith.constant 0 : i32
    return %c0_i32, %c0_i32_0 : i32, i32
  }
  func.func @transform_4(%arg0: i32, %arg1: i32) -> (i32, i32, i32) {
    %c0_i32 = arith.constant 0 : i32
    %c0_i32_0 = arith.constant 0 : i32
    return %arg0, %c0_i32, %arg1 : i32, i32, i32
  }
  func.func @transform_5(%arg0: i32, %arg1: i32) -> (i32, i32, i32) {
    %c0_i32 = arith.constant 0 : i32
    %c0_i32_0 = arith.constant 0 : i32
    return %arg0, %c0_i32, %arg1 : i32, i32, i32
  }
}

</mosaic_0001>

<bundles_post_ra>
// kernel: _lambda_.3
= control target key start
LH: loop header
LB: loop body
LE: loop exit
PB: predicated region body
PF: predicated region fallthrough
CT: control target
= control target key end

     0   :  { %s559_s15 = smov 0   ;;  %s561_s16 = smov 0   ;;  %s611_s0 = inlined_call_operand.vmem [shape: bf16[2,8,256], index: 0, kind: input, shape index: {}]   ;;  %s612_s1 = inlined_call_operand.vmem [shape: bf16[1,4,8], index: 1, kind: input, shape index: {}]   ;;  %s613_s2 = inlined_call_operand.vmem [shape: f32[4,1], index: 2, kind: input, shape index: {}]   ;;  %s614_s3 = inlined_call_operand.vmem [shape: f32[4,1], index: 3, kind: input, shape index: {}]   ;;  %s615_s4 = inlined_call_operand.vmem [shape: bf16[2,4,256], index: 4, kind: output, shape index: {}]  }
   0x1   :  { %s563_s17 = smov 0  }
   0x2 LB: > { %s26_s18 = sadd.s32 1, %s527_s16  ;;  %p462_p0 = scmp.ge.s32.totalorder %s531_s17, 1  ;;  %s531_s17 = sphi %s563_s17, %s14_s17   ;;  %s527_s16 = sphi %s561_s16, %s617_s16   ;;  %s523_s15 = sphi %s559_s15, %s616_s15  }
   0x3   : > { %p28_p1 = scmp.ge.s32.totalorder %s26_s18, 2  ;;  %p183_p2 = scmp.lt.s32.totalorder %s531_s17, 3 }
   0x5   : > { %s619_s18 = smov (%p28_p1, %s26_s18), 0  ;;  %p184_p3 = pnand %p462_p0, %p183_p2 }
   0x6   : > { %p218_p4 = scmp.lt.s32.totalorder (!%p184_p3), %s523_s15, 1 }
   0x7   : > { %187 = sbr.rel (%p184_p3) target bundleno = 278 (0x116), region = 36 }
   0xc   : > { %v533_v0 = vmov 0   ;;  %v339_v1 = vld [vmem:[%s613_s2] sm:$0xf]  ;;  %s621_s15 = smov (!%p218_p4, %s523_s15), 1  ;;  %vm249_vm0 = vcmask 1043456   ;;  %vm245_vm1 = vcmask 64512  }
   0xd   : > { %288 = vmatprep.mubr.bf16.mxu0 %v533_v0  ;;  %502 = vset.pattern.permute.xlu0 %v533_v0  ;;  %v347_v2 = vld [vmem:[%s614_s3] sm:$0xf]  ;;  %s475_s23 = sshll.u32 %s621_s15, 3  ;;  %s476_s29 = sshll.u32 %s621_s15, 2 }
   0xe   : > { %342 = vperm.xlu0 %502, %v339_v1   ;;  %s225_s26 = scalar_lea.vmem %s611_s0, %s475_s23  ;;  %v238_v7 = vld [vmem:[%s612_s1] sm:$0x3]  ;;  %s235_s6 = scalar_lea.vmem %s615_s4, %s476_s29 }
   0xf   : > { %v239_v3 = vld [vmem:[%s225_s26] sm:$0xff] }
  0x10   : > { %v468_v4 = vcombine.high %v239_v3, %v239_v3  ;;  %v467_v5 = vcombine.low %v239_v3, %v239_v3 }
  0x12   : > { %350 = vperm.xlu0 %502, %v347_v2   ;;  %469 = vmatprep.subr.msk.bf16.mxu0 %vm249_vm0, %v468_v4  ;;  %v251_v6 = vsel %vm249_vm0, %v467_v5, 0 }
  0x13   : > { %271 = vmatpush1.bf16.msra.mxu0 %v251_v6 }
  0x16   : > { %470 = vmatmul.mubr.msk.bf16.vlgmr.msra.gmra.mxu0 %vm245_vm1, %v238_v7 }
  0x89   : > { %v343_v50 = vpop.permute.xlu0 %342 }
  0x8d   : > { %v351_v56 = vpop.permute.xlu0 %350 }
  0xd6   : > { %v290_v8 = vpop.f32.mrf.mxu0 }
  0xd7   : > { %v297_v9 = vsel %vm249_vm0, %v290_v8, 0.0 }
  0xd8   : > { %v298_v10 = vrot.slane %v297_v9, 4  ;;  %v292_v11 = vpop.f32.mrf.mxu0 }
  0xd9   : > { %v304_v12 = vsel %vm249_vm0, %v292_v11, 0.0 }
  0xda   : > { %v299_v13 = vadd.f32 %v298_v10, %v297_v9  ;;  %v305_v14 = vrot.slane %v304_v12, 4  ;;  %v294_v15 = vpop.f32.mrf.mxu0 }
  0xdc   : > { %v300_v16 = vrot.slane %v299_v13, 2  ;;  %v306_v17 = vadd.f32 %v305_v14, %v304_v12  ;;  %v295_v18 = vpop.f32.mrf.mxu0 }
  0xde   : > { %v301_v19 = vadd.f32 %v300_v16, %v299_v13  ;;  %v307_v20 = vrot.slane %v306_v17, 2 }
  0xe0   : > { %v302_v21 = vrot.slane %v301_v19, 1  ;;  %v308_v22 = vadd.f32 %v307_v20, %v306_v17 }
  0xe2   : > { %v303_v23 = vadd.f32 %v302_v21, %v301_v19  ;;  %v309_v24 = vrot.slane %v308_v22, 1 }
  0xe4   : > { %v311_v25 = vmul.f32 0.25, %v303_v23  ;;  %v310_v26 = vadd.f32 %v309_v24, %v308_v22 }
  0xe6   : > { %v313_v27 = vsub.f32 %v290_v8, %v311_v25  ;;  %v312_v28 = vmul.f32 0.25, %v310_v26 }
  0xe8   : > { %v315_v29 = vmul.f32 %v313_v27, %v313_v27  ;;  %v314_v30 = vsub.f32 %v292_v11, %v312_v28 }
  0xea   : > { %v317_v31 = vsel %vm249_vm0, %v315_v29, 0.0  ;;  %v316_v32 = vmul.f32 %v314_v30, %v314_v30 }
  0xeb   : > { %v318_v33 = vrot.slane %v317_v31, 4 }
  0xec   : > { %v324_v34 = vsel %vm249_vm0, %v316_v32, 0.0 }
  0xed   : > { %v319_v35 = vadd.f32 %v318_v33, %v317_v31  ;;  %v325_v36 = vrot.slane %v324_v34, 4 }
  0xef   : > { %v320_v37 = vrot.slane %v319_v35, 2  ;;  %v326_v38 = vadd.f32 %v325_v36, %v324_v34 }
  0xf1   : > { %v321_v39 = vadd.f32 %v320_v37, %v319_v35  ;;  %v327_v40 = vrot.slane %v326_v38, 2 }
  0xf3   : > { %v322_v41 = vrot.slane %v321_v39, 1  ;;  %v328_v42 = vadd.f32 %v327_v40, %v326_v38 }
  0xf5   : > { %v323_v43 = vadd.f32 %v322_v41, %v321_v39  ;;  %v329_v44 = vrot.slane %v328_v42, 1 }
  0xf7   : > { %v331_v45 = vmul.f32 0.25, %v323_v43  ;;  %v330_v46 = vadd.f32 %v329_v44, %v328_v42 }
  0xf9   : > { %v333_v47 = vadd.f32 1e-06, %v331_v45  ;;  %v332_v48 = vmul.f32 0.25, %v330_v46 }
  0xfb   : > { %505 = vrsqrt.f32 %v333_v47  ;;  %v334_v49 = vadd.f32 1e-06, %v332_v48 }
  0xfd   : > { %507 = vrsqrt.f32 %v334_v49 }
 0x108   : > { %v506_v51 = vpop.eup %505 }
 0x109   : > { %v337_v52 = vmul.f32 %v506_v51, %v313_v27 }
 0x10a   : > { %v508_v53 = vpop.eup %507 }
 0x10b   : > { %v338_v54 = vmul.f32 %v508_v53, %v314_v30  ;;  %v345_v55 = vmul.f32 %v343_v50, %v337_v52 }
 0x10d   : > { %v346_v57 = vmul.f32 %v343_v50, %v338_v54  ;;  %v353_v58 = vadd.f32 %v351_v56, %v345_v55 }
 0x10f   : > { %v354_v59 = vadd.f32 %v351_v56, %v346_v57  ;;  %v355_v60 = vmax.f32 %v353_v58, 0.0 }
 0x111   : > { %v356_v61 = vmax.f32 %v354_v59, 0.0 }
 0x113   : > { %v471_v62 = vpack.c.bf16 %v356_v61, %v355_v60 }
 0x115   : > { %472 = vst.sshfl [vmem:[%s235_s6] sm:$0x33 pattern:$0x76325410] %v471_v62 }
 0x116 PF: > { %s14_s17 = sadd.s32 1, %s531_s17   ;;  %s616_s15 = smov %s527_s16 }
 0x117   : > { %p11_p5 = scmp.ge.s32.totalorder %s14_s17, 4   ;;  %s617_s16 = smov %s619_s18 }
 0x119   :  { %13 = sbr.rel (!%p11_p5) target bundleno = 2 (0x2), region = 66 }

// kernel: _lambda_.5
= control target key start
LH: loop header
LB: loop body
LE: loop exit
PB: predicated region body
PF: predicated region fallthrough
CT: control target
= control target key end

     0   :  { %s638_s18 = smov 0   ;;  %s640_s19 = smov 0   ;;  %s688_s0 = inlined_call_operand.vmem [shape: bf16[2,4,256], index: 0, kind: input, shape index: {}]   ;;  %s689_s1 = inlined_call_operand.vmem [shape: bf16[1,8,4], index: 1, kind: input, shape index: {}]   ;;  %s690_s2 = inlined_call_operand.vmem [shape: f32[8,1], index: 2, kind: input, shape index: {}]   ;;  %s691_s3 = inlined_call_operand.vmem [shape: f32[8,1], index: 3, kind: input, shape index: {}]   ;;  %s692_s4 = inlined_call_operand.vmem [shape: bf16[2,8,256], index: 4, kind: input, shape index: {}]   ;;  %s693_s5 = inlined_call_operand.vmem [shape: f32[2,8,256], index: 5, kind: output, shape index: {}]  }
   0x1   :  { %s642_s20 = smov 0  }
   0x2 LB: > { %s27_s21 = sadd.s32 1, %s601_s19  ;;  %p538_p0 = scmp.ge.s32.totalorder %s605_s20, 1  ;;  %s605_s20 = sphi %s642_s20, %s15_s20   ;;  %s601_s19 = sphi %s640_s19, %s695_s19   ;;  %s597_s18 = sphi %s638_s18, %s694_s18  }
   0x3   : > { %p29_p1 = scmp.ge.s32.totalorder %s27_s21, 2  ;;  %p225_p2 = scmp.lt.s32.totalorder %s605_s20, 3 }
   0x5   : > { %s697_s21 = smov (%p29_p1, %s27_s21), 0  ;;  %p226_p3 = pnand %p538_p0, %p225_p2 }
   0x6   : > { %p271_p4 = scmp.lt.s32.totalorder (!%p226_p3), %s597_s18, 1 }
   0x7   : > { %229 = sbr.rel (%p226_p3) target bundleno = 278 (0x116), region = 40 }
   0xc   : > { %v607_v0 = vmov 0   ;;  %v402_v1 = vld [vmem:[%s690_s2] sm:$0xff]  ;;  %s699_s18 = smov (!%p271_p4, %s597_s18), 1  ;;  %vm316_vm0 = vcmask 1041408   ;;  %vm312_vm1 = vcmask 31744  }
   0xd   : > { %355 = vmatprep.mubr.bf16.mxu0 %v607_v0  ;;  %578 = vset.pattern.permute.xlu0 %v607_v0  ;;  %v410_v2 = vld [vmem:[%s691_s3] sm:$0xff]  ;;  %s550_s26 = sshll.u32 %s699_s18, 2  ;;  %s551_s7 = sshll.u32 %s699_s18, 3 }
   0xe   : > { %405 = vperm.xlu0 %578, %v402_v1   ;;  %s278_s29 = scalar_lea.vmem %s688_s0, %s550_s26  ;;  %v301_v6 = vld [vmem:[%s689_s1] sm:$0xf]  ;;  %s288_s10 = scalar_lea.vmem %s692_s4, %s551_s7 }
   0xf   : > { %v545_v3 = vld.sshfl [vmem:[%s278_s29] sm:$0x33 pattern:$0x76325410]  ;;  %s552_s11 = sshll.u32 %s699_s18, 4 }
  0x10   : > { %v311_v4 = vcombine.high %v545_v3, %v545_v3  ;;  %v318_v5 = vsel %vm316_vm0, %v545_v3, 0  ;;  %v420_v49 = vld [vmem:[%s288_s10] sm:$0xff]  ;;  %s298_s14 = scalar_lea.vmem %s693_s5, %s552_s11 }
  0x11   : > { %v421_v55 = vunpack.c.l.bf16 %v420_v49  ;;  %v422_v58 = vunpack.c.h.bf16 %v420_v49 }
  0x12   : > { %413 = vperm.xlu0 %578, %v410_v2   ;;  %546 = vmatprep.subr.msk.bf16.mxu0 %vm316_vm0, %v311_v4 }
  0x13   : > { %338 = vmatpush1.bf16.msra.mxu0 %v318_v5 }
  0x16   : > { %547 = vmatmul.mubr.msk.bf16.vlgmr.msra.gmra.mxu0 %vm312_vm1, %v301_v6 }
  0x89   : > { %v406_v45 = vpop.permute.xlu0 %405 }
  0x8d   : > { %v414_v52 = vpop.permute.xlu0 %413 }
  0xd6   : > { %v357_v7 = vpop.f32.mrf.mxu0 }
  0xd7   : > { %v364_v8 = vrot.slane %v357_v7, 4 }
  0xd8   : > { %v359_v9 = vpop.f32.mrf.mxu0 }
  0xd9   : > { %v365_v10 = vadd.f32 %v364_v8, %v357_v7  ;;  %v370_v11 = vrot.slane %v359_v9, 4 }
  0xda   : > { %v361_v12 = vpop.f32.mrf.mxu0 }
  0xdb   : > { %v366_v13 = vrot.slane %v365_v10, 2  ;;  %v371_v14 = vadd.f32 %v370_v11, %v359_v9 }
  0xdc   : > { %v362_v15 = vpop.f32.mrf.mxu0 }
  0xdd   : > { %v367_v16 = vadd.f32 %v366_v13, %v365_v10  ;;  %v372_v17 = vrot.slane %v371_v14, 2 }
  0xdf   : > { %v368_v18 = vrot.slane %v367_v16, 1  ;;  %v373_v19 = vadd.f32 %v372_v17, %v371_v14 }
  0xe1   : > { %v369_v20 = vadd.f32 %v368_v18, %v367_v16  ;;  %v374_v21 = vrot.slane %v373_v19, 1 }
  0xe3   : > { %v376_v22 = vmul.f32 0.125, %v369_v20  ;;  %v375_v23 = vadd.f32 %v374_v21, %v373_v19 }
  0xe5   : > { %v378_v24 = vsub.f32 %v357_v7, %v376_v22  ;;  %v377_v25 = vmul.f32 0.125, %v375_v23 }
  0xe7   : > { %v380_v26 = vmul.f32 %v378_v24, %v378_v24  ;;  %v379_v27 = vsub.f32 %v359_v9, %v377_v25 }
  0xe9   : > { %v382_v28 = vrot.slane %v380_v26, 4  ;;  %v381_v29 = vmul.f32 %v379_v27, %v379_v27 }
  0xeb   : > { %v383_v30 = vadd.f32 %v382_v28, %v380_v26  ;;  %v388_v31 = vrot.slane %v381_v29, 4 }
  0xed   : > { %v384_v32 = vrot.slane %v383_v30, 2  ;;  %v389_v33 = vadd.f32 %v388_v31, %v381_v29 }
  0xef   : > { %v385_v34 = vadd.f32 %v384_v32, %v383_v30  ;;  %v390_v35 = vrot.slane %v389_v33, 2 }
  0xf1   : > { %v386_v36 = vrot.slane %v385_v34, 1  ;;  %v391_v37 = vadd.f32 %v390_v35, %v389_v33 }
  0xf3   : > { %v387_v38 = vadd.f32 %v386_v36, %v385_v34  ;;  %v392_v39 = vrot.slane %v391_v37, 1 }
  0xf5   : > { %v394_v40 = vmul.f32 0.125, %v387_v38  ;;  %v393_v41 = vadd.f32 %v392_v39, %v391_v37 }
  0xf7   : > { %v396_v42 = vadd.f32 1e-06, %v394_v40  ;;  %v395_v43 = vmul.f32 0.125, %v393_v41 }
  0xf9   : > { %579 = vrsqrt.f32 %v396_v42  ;;  %v397_v44 = vadd.f32 1e-06, %v395_v43 }
  0xfb   : > { %581 = vrsqrt.f32 %v397_v44 }
 0x106   : > { %v580_v46 = vpop.eup %579 }
 0x107   : > { %v400_v47 = vmul.f32 %v580_v46, %v378_v24 }
 0x108   : > { %v582_v48 = vpop.eup %581 }
 0x109   : > { %v401_v50 = vmul.f32 %v582_v48, %v379_v27  ;;  %v408_v51 = vmul.f32 %v406_v45, %v400_v47 }
 0x10b   : > { %v409_v53 = vmul.f32 %v406_v45, %v401_v50  ;;  %v416_v54 = vadd.f32 %v414_v52, %v408_v51 }
 0x10d   : > { %v417_v56 = vadd.f32 %v414_v52, %v409_v53  ;;  %v418_v57 = vmax.f32 %v416_v54, 0.0 }
 0x10f   : > { %v419_v59 = vmax.f32 %v417_v56, 0.0  ;;  %v423_v60 = vadd.f32 %v421_v55, %v418_v57 }
 0x111   : > { %v424_v61 = vadd.f32 %v422_v58, %v419_v59  ;;  %v425_v62 = vmax.f32 %v423_v60, 0.0 }
 0x113   : > { %v426_v63 = vmax.f32 %v424_v61, 0.0  ;;  %427 = vst [vmem:[%s298_s14] sm:$0xff] %v425_v62 }
 0x115   : > { %428 = vst [vmem:[%s298_s14 + $0x8] sm:$0xff] %v426_v63 }
 0x116 PF: > { %s15_s20 = sadd.s32 1, %s605_s20   ;;  %s694_s18 = smov %s601_s19 }
 0x117   : > { %p12_p5 = scmp.ge.s32.totalorder %s15_s20, 4   ;;  %s695_s19 = smov %s697_s21 }
 0x119   :  { %14 = sbr.rel (!%p12_p5) target bundleno = 2 (0x2), region = 73 }

// kernel: _lambda_.4
= control target key start
LH: loop header
LB: loop body
LE: loop exit
PB: predicated region body
PF: predicated region fallthrough
CT: control target
= control target key end

     0   :  { %s1763_s15 = smov 0   ;;  %s1765_s16 = smov 0   ;;  %s1972_s0 = inlined_call_operand.vmem [shape: bf16[2,4,326], index: 0, kind: input, shape index: {}]   ;;  %s1973_s1 = inlined_call_operand.vmem [shape: bf16[9,4,4], index: 1, kind: input, shape index: {}]   ;;  %s1974_s2 = inlined_call_operand.vmem [shape: f32[4,1], index: 2, kind: input, shape index: {}]   ;;  %s1975_s3 = inlined_call_operand.vmem [shape: f32[4,1], index: 3, kind: input, shape index: {}]   ;;  %s1976_s4 = inlined_call_operand.vmem [shape: bf16[2,4,288], index: 4, kind: output, shape index: {}]  }
   0x1   :  { %s1767_s17 = smov 0  }
   0x2 LB: > { %s26_s18 = sadd.s32 1, %s1720_s16  ;;  %p1536_p0 = scmp.ge.s32.totalorder %s1724_s17, 1  ;;  %s1724_s17 = sphi %s1767_s17, %s14_s17   ;;  %s1720_s16 = sphi %s1765_s16, %s1978_s16   ;;  %s1716_s15 = sphi %s1763_s15, %s1977_s15  }
   0x3   : > { %p28_p1 = scmp.ge.s32.totalorder %s26_s18, 2  ;;  %p183_p2 = scmp.lt.s32.totalorder %s1724_s17, 3 }
   0x5   : > { %s1980_s18 = smov (%p28_p1, %s26_s18), 0  ;;  %p184_p3 = pnand %p1536_p0, %p183_p2 }
   0x6   : > { %p218_p4 = scmp.lt.s32.totalorder (!%p184_p3), %s1716_s15, 1  ;;  %s1730_s23 = smov (!%p184_p3), 127  }
   0x7   : > { %187 = sbr.rel (%p184_p3) target bundleno = 471 (0x1d7), region = 36  ;;  %s1731_s24 = smov (!%p184_p3), 126  }
   0x8   : > { %s1732_s25 = smov (!%p184_p3), 110   ;;  %s1733_s26 = smov (!%p184_p3), 109  }
   0x9   : > { %s1734_s27 = smov (!%p184_p3), 108   ;;  %s1735_s28 = smov (!%p184_p3), 92  }
   0xa   : > { %s1736_s29 = smov (!%p184_p3), 91   ;;  %s1737_s30 = smov (!%p184_p3), 90  }
   0xc   : > { %v247_v0 = vlaneseq  ;;  %v1726_v1 = vmov 1983009808   ;;  %v1727_v3 = vmov 0.0   ;;  %s1982_s15 = smov (!%p218_p4, %s1716_s15), 1  ;;  %vm1728_vm0 = vmmov 0  }
   0xd   : > { %v245_v2 = vunpack.c.l.s4 %v1726_v1  ;;  %1595 = vmatprep.subr.bf16.mxu1 %v1727_v3  ;;  %1597 = vmatprep.mubr.msk.bf16.mxu1 %vm1728_vm0, %v1727_v3  ;;  %s1649_s19 = smul.u32 6, %s1982_s15  ;;  %v1729_v6 = vmov 0   ;;  %v1396_v48 = vld [vmem:[%s1974_s2] sm:$0xf]  ;;  %vm272_vm1 = vcmask 1041408   ;;  %vm265_vm2 = vcmask 1039360  }
   0xe   : > { %v248_v4 = vshrl.u32 %v247_v0, 7  ;;  %314 = vmatprep.mubr.bf16.mxu0 %v1729_v6  ;;  %1686 = vset.pattern.permute.xlu0 %v1729_v6  ;;  %v1405_v49 = vld [vmem:[%s1975_s3] sm:$0xf]  ;;  %vm268_vm3 = vcmask 31744   ;;  %vm482_vm4 = vcmask 1031168   ;;  %vm607_vm5 = vcmask 900096  }
   0xf   : > { %v246_v5 = vunpack.c.0.s8 %v245_v2  ;;  %1687 = vset.pattern.permute.xlu1 %v1729_v6  ;;  %s1797_s22 = scalar_lea.vmem %s1972_s0, %s1649_s19  ;;  %v1539_v54 = vld [vmem:[%s1973_s1 + $0x2] sm:$0x3]  ;;  %v238_v0 = vld [vmem:[%s1973_s1] sm:$0x3]  ;;  %vm732_vm6 = vcmask 891904   ;;  %vm857_vm7 = vcmask 883712   ;;  %s235_s8 = scalar_lea.vmem %s1976_s4, %s1649_s19 }
  0x10   : > { %v239_v8 = vld [vmem:[%s1797_s22] sm:$0x3f]  ;;  %vm982_vm8 = vcmask 752640   ;;  %vm1107_vm9 = vcmask 744448   ;;  %vm1232_vm10 = vcmask 736256   ;;  %vm1346_vm11 = vcmask 257024  }
  0x11   : > { %v1789_v7 = vsub.s32 %v246_v5, %v248_v4  ;;  %v243_v10 = vcombine.high %v239_v8, %v239_v8  ;;  %v458_v11 = vld [vmem:[%s1797_s22] sm:$0x3f]  ;;  %vm1331_vm12 = vcmask 1043456   ;;  %vm1440_vm13 = vcmask 1043458  }
  0x12   : > { %v460_v15 = vcombine.high %v458_v11, %v458_v11  ;;  %v583_v17 = vld [vmem:[%s1797_s22] sm:$0x3f]  ;;  %vm1441_vm14 = vmor %vm1440_vm13, %vm272_vm1  ;;  %vm1442_vm15 = vcmask 259076  }
  0x13   : > { %v1801_v9 = vrot.slane %v239_v8, %v1789_v7  ;;  %v1806_v12 = vrot.slane %v243_v10, %v1789_v7  ;;  %v467_v14 = vrot.slane %v458_v11, %v1789_v7  ;;  %v592_v19 = vrot.slane %v583_v17, %v1789_v7  ;;  %v708_v22 = vld [vmem:[%s1797_s22] sm:$0x3f] }
  0x14   : > { %v474_v18 = vrot.slane %v460_v15, %v1789_v7  ;;  %v585_v20 = vcombine.high %v583_v17, %v583_v17  ;;  %v717_v24 = vrot.slane %v708_v22, %v1789_v7  ;;  %v710_v25 = vcombine.high %v708_v22, %v708_v22  ;;  %v833_v27 = vld [vmem:[%s1797_s22] sm:$0x3f] }
  0x15   : > { %259 = vrot.lane.b32.xlu0 %v1801_v9, %s1730_s23  ;;  %v1810_v13 = vcombine.high %v1801_v9, %v1801_v9  ;;  %263 = vrot.lane.b32.xlu1 %v1806_v12, %s1730_s23  ;;  %v475_v16 = vcombine.high %v467_v14, %v467_v14  ;;  %v600_v21 = vcombine.high %v592_v19, %v592_v19  ;;  %v958_v32 = vld [vmem:[%s1797_s22] sm:$0x3f]  ;;  %v373_v57 = vsel %vm272_vm1, %v1806_v12, 0 }
  0x16   : > { %v599_v23 = vrot.slane %v585_v20, %v1789_v7  ;;  %v725_v26 = vcombine.high %v717_v24, %v717_v24  ;;  %v724_v28 = vrot.slane %v710_v25, %v1789_v7  ;;  %v842_v29 = vrot.slane %v833_v27, %v1789_v7  ;;  %v1083_v37 = vld [vmem:[%s1797_s22] sm:$0x3f] }
  0x17   : > { %v835_v30 = vcombine.high %v833_v27, %v833_v27  ;;  %v967_v34 = vrot.slane %v958_v32, %v1789_v7  ;;  %v960_v35 = vcombine.high %v958_v32, %v958_v32  ;;  %v1092_v39 = vrot.slane %v1083_v37, %v1789_v7  ;;  %v1208_v42 = vld [vmem:[%s1797_s22] sm:$0x3f] }
  0x18   : > { %v850_v31 = vcombine.high %v842_v29, %v842_v29  ;;  %v1085_v40 = vcombine.high %v1083_v37, %v1083_v37  ;;  %v1217_v44 = vrot.slane %v1208_v42, %v1789_v7  ;;  %v1210_v45 = vcombine.high %v1208_v42, %v1208_v42  ;;  %v1546_v12 = vld [vmem:[%s1973_s1 + $0x4] sm:$0x3]  ;;  %v1558_v37 = vld [vmem:[%s1973_s1 + $0xa] sm:$0x3] }
  0x19   : > { %261 = vrot.lane.b32.xlu0 %v1810_v13, %s1730_s23  ;;  %476 = vrot.lane.b32.xlu1 %v467_v14, %s1731_s24  ;;  %v849_v33 = vrot.slane %v835_v30, %v1789_v7  ;;  %v975_v36 = vcombine.high %v967_v34, %v967_v34  ;;  %v974_v38 = vrot.slane %v960_v35, %v1789_v7  ;;  %v367_v60 = vsel %vm272_vm1, %v1801_v9, 0 }
  0x1a   : > { %v1100_v41 = vcombine.high %v1092_v39, %v1092_v39  ;;  %v1099_v43 = vrot.slane %v1085_v40, %v1789_v7  ;;  %v1225_v46 = vcombine.high %v1217_v44, %v1217_v44  ;;  %v1224_v47 = vrot.slane %v1210_v45, %v1789_v7 }
  0x1d   : > { %478 = vrot.lane.b32.xlu0 %v475_v16, %s1731_s24  ;;  %480 = vrot.lane.b32.xlu1 %v474_v18, %s1731_s24 }
  0x21   : > { %601 = vrot.lane.b32.xlu0 %v592_v19, %s1732_s25  ;;  %603 = vrot.lane.b32.xlu1 %v600_v21, %s1732_s25  ;;  %v1550_v21 = vld [vmem:[%s1973_s1 + $0x6] sm:$0x3] }
  0x25   : > { %605 = vrot.lane.b32.xlu0 %v599_v23, %s1732_s25  ;;  %726 = vrot.lane.b32.xlu1 %v717_v24, %s1733_s26 }
  0x29   : > { %728 = vrot.lane.b32.xlu0 %v725_v26, %s1733_s26  ;;  %730 = vrot.lane.b32.xlu1 %v724_v28, %s1733_s26 }
  0x2d   : > { %851 = vrot.lane.b32.xlu0 %v842_v29, %s1734_s27  ;;  %853 = vrot.lane.b32.xlu1 %v850_v31, %s1734_s27  ;;  %v1554_v29 = vld [vmem:[%s1973_s1 + $0x8] sm:$0x3] }
  0x31   : > { %855 = vrot.lane.b32.xlu0 %v849_v33, %s1734_s27  ;;  %976 = vrot.lane.b32.xlu1 %v967_v34, %s1735_s28 }
  0x35   : > { %978 = vrot.lane.b32.xlu0 %v975_v36, %s1735_s28  ;;  %980 = vrot.lane.b32.xlu1 %v974_v38, %s1735_s28 }
  0x39   : > { %1101 = vrot.lane.b32.xlu0 %v1092_v39, %s1736_s29  ;;  %1103 = vrot.lane.b32.xlu1 %v1100_v41, %s1736_s29 }
  0x3d   : > { %1105 = vrot.lane.b32.xlu0 %v1099_v43, %s1736_s29  ;;  %1226 = vrot.lane.b32.xlu1 %v1217_v44, %s1737_s30  ;;  %v1562_v44 = vld [vmem:[%s1973_s1 + $0xc] sm:$0x3] }
  0x41   : > { %1228 = vrot.lane.b32.xlu0 %v1225_v46, %s1737_s30  ;;  %1230 = vrot.lane.b32.xlu1 %v1224_v47, %s1737_s30 }
  0x45   : > { %1399 = vperm.xlu0 %1686, %v1396_v48   ;;  %1408 = vperm.xlu1 %1687, %v1405_v49  }
  0x87   : > { %v260_v50 = vpop.permute.xlu0 %259  ;;  %v264_v51 = vpop.permute.xlu1 %263 }
  0x88   : > { %v280_v52 = vsel %vm272_vm1, %v264_v51, 0 }
  0x89   : > { %1596 = vmatpush3.bf16.msra.mxu1 %v280_v52 }
  0x8a   : > { %1601 = vmatprep.subr.bf16.mxu1 %v1727_v3 }
  0x8b   : > { %v262_v53 = vpop.permute.xlu0 %261  ;;  %v477_v59 = vpop.permute.xlu1 %476 }
  0x8c   : > { %v267_v55 = vsel %vm265_vm2, %v262_v53, %v264_v51  ;;  %v266_v56 = vsel %vm265_vm2, %v260_v50, %v262_v53  ;;  %1598 = vmatmul.mubr.msk.bf16.vlgmr.msra.gmra.mxu1 %vm268_vm3, %v1539_v54  ;;  %v1566_v51 = vld [vmem:[%s1973_s1 + $0xe] sm:$0x3] }
  0x8d   : > { %1540 = vmatprep.subr.msk.bf16.mxu0 %vm272_vm1, %v267_v55  ;;  %v274_v58 = vsel %vm272_vm1, %v266_v56, 0  ;;  %1602 = vmatpush3.bf16.msra.mxu1 %v373_v57  ;;  %v1570_v55 = vld [vmem:[%s1973_s1 + $0x10] sm:$0x3] }
  0x8e   : > { %297 = vmatpush1.bf16.msra.mxu0 %v274_v58  ;;  %1603 = vmatprep.mubr.msk.bf16.mxu1 %vm1728_vm0, %v1727_v3 }
  0x8f   : > { %1543 = vmatprep.subr.msk.bf16.mxu0 %vm272_vm1, %v1810_v13  ;;  %v479_v61 = vpop.permute.xlu0 %478  ;;  %1607 = vmatprep.subr.bf16.mxu1 %v1727_v3  ;;  %v481_v62 = vpop.permute.xlu1 %480 }
  0x90   : > { %v484_v63 = vsel %vm482_vm4, %v479_v61, %v481_v62  ;;  %v483_v2 = vsel %vm482_vm4, %v477_v59, %v479_v61  ;;  %v495_v4 = vsel %vm272_vm1, %v481_v62, 0 }
  0x91   : > { %1541 = vmatmul.mubr.msk.bf16.vlgmr.msra.gmra.mxu0 %vm268_vm3, %v1539_v54  ;;  %v489_v8 = vsel %vm272_vm1, %v483_v2, 0 }
  0x92   : > { %390 = vmatpush1.bf16.msra.mxu0 %v367_v60  ;;  %407 = vmatprep.mubr.bf16.mxu0 %v1729_v6 }
  0x93   : > { %1547 = vmatprep.subr.msk.bf16.mxu0 %vm272_vm1, %v484_v63  ;;  %v602_v1 = vpop.permute.xlu0 %601  ;;  %v604_v5 = vpop.permute.xlu1 %603 }
  0x94   : > { %1604 = vmatmul.mubr.msk.bf16.vlgmr.msra.gmra.mxu1 %vm268_vm3, %v238_v0  ;;  %v608_v14 = vsel %vm607_vm5, %v602_v1, %v604_v5 }
  0x95   : > { %1608 = vmatpush3.bf16.msra.mxu1 %v495_v4  ;;  %1609 = vmatprep.mubr.msk.bf16.mxu1 %vm1728_vm0, %v1727_v3  ;;  %v614_v17 = vsel %vm272_vm1, %v608_v14, 0 }
  0x96   : > { %1613 = vmatprep.subr.bf16.mxu1 %v1727_v3 }
  0x97   : > { %v606_v9 = vpop.permute.xlu0 %605  ;;  %v727_v11 = vpop.permute.xlu1 %726 }
  0x98   : > { %v609_v10 = vsel %vm607_vm5, %v604_v5, %v606_v9  ;;  %v620_v15 = vsel %vm272_vm1, %v606_v9, 0 }
  0x99   : > { %1544 = vmatmul.mubr.msk.bf16.vlgmr.msra.gmra.mxu0 %vm268_vm3, %v238_v0 }
  0x9a   : > { %512 = vmatpush1.bf16.msra.mxu0 %v489_v8  ;;  %529 = vmatprep.mubr.bf16.mxu0 %v1729_v6 }
  0x9b   : > { %1551 = vmatprep.subr.msk.bf16.mxu0 %vm272_vm1, %v609_v10  ;;  %v729_v13 = vpop.permute.xlu0 %728  ;;  %v731_v16 = vpop.permute.xlu1 %730 }
  0x9c   : > { %1610 = vmatmul.mubr.msk.bf16.vlgmr.msra.gmra.mxu1 %vm268_vm3, %v1546_v12  ;;  %v734_v19 = vsel %vm732_vm6, %v729_v13, %v731_v16  ;;  %v733_v22 = vsel %vm732_vm6, %v727_v11, %v729_v13  ;;  %v745_v23 = vsel %vm272_vm1, %v731_v16, 0 }
  0x9d   : > { %1614 = vmatpush3.bf16.msra.mxu1 %v620_v15  ;;  %1615 = vmatprep.mubr.msk.bf16.mxu1 %vm1728_vm0, %v1727_v3  ;;  %v739_v25 = vsel %vm272_vm1, %v733_v22, 0 }
  0x9e   : > { %1619 = vmatprep.subr.bf16.mxu1 %v1727_v3 }
  0x9f   : > { %v852_v18 = vpop.permute.xlu0 %851  ;;  %v854_v20 = vpop.permute.xlu1 %853 }
  0xa0   : > { %v858_v30 = vsel %vm857_vm7, %v852_v18, %v854_v20 }
  0xa1   : > { %1548 = vmatmul.mubr.msk.bf16.vlgmr.msra.gmra.mxu0 %vm268_vm3, %v1546_v12  ;;  %v864_v33 = vsel %vm272_vm1, %v858_v30, 0 }
  0xa2   : > { %637 = vmatpush1.bf16.msra.mxu0 %v614_v17  ;;  %654 = vmatprep.mubr.bf16.mxu0 %v1729_v6 }
  0xa3   : > { %1555 = vmatprep.subr.msk.bf16.mxu0 %vm272_vm1, %v734_v19  ;;  %v856_v24 = vpop.permute.xlu0 %855  ;;  %v977_v26 = vpop.permute.xlu1 %976 }
  0xa4   : > { %1616 = vmatmul.mubr.msk.bf16.vlgmr.msra.gmra.mxu1 %vm268_vm3, %v1550_v21  ;;  %v859_v27 = vsel %vm857_vm7, %v854_v20, %v856_v24  ;;  %v870_v31 = vsel %vm272_vm1, %v856_v24, 0 }
  0xa5   : > { %1620 = vmatpush3.bf16.msra.mxu1 %v745_v23  ;;  %1621 = vmatprep.mubr.msk.bf16.mxu1 %vm1728_vm0, %v1727_v3 }
  0xa6   : > { %1625 = vmatprep.subr.bf16.mxu1 %v1727_v3 }
  0xa7   : > { %v979_v28 = vpop.permute.xlu0 %978  ;;  %v981_v32 = vpop.permute.xlu1 %980 }
  0xa8   : > { %v984_v35 = vsel %vm982_vm8, %v979_v28, %v981_v32  ;;  %v983_v38 = vsel %vm982_vm8, %v977_v26, %v979_v28  ;;  %v995_v39 = vsel %vm272_vm1, %v981_v32, 0 }
  0xa9   : > { %1552 = vmatmul.mubr.msk.bf16.vlgmr.msra.gmra.mxu0 %vm268_vm3, %v1550_v21  ;;  %v989_v41 = vsel %vm272_vm1, %v983_v38, 0 }
  0xaa   : > { %762 = vmatpush1.bf16.msra.mxu0 %v739_v25  ;;  %779 = vmatprep.mubr.bf16.mxu0 %v1729_v6 }
  0xab   : > { %1559 = vmatprep.subr.msk.bf16.mxu0 %vm272_vm1, %v859_v27  ;;  %v1102_v34 = vpop.permute.xlu0 %1101  ;;  %v1104_v36 = vpop.permute.xlu1 %1103 }
  0xac   : > { %1622 = vmatmul.mubr.msk.bf16.vlgmr.msra.gmra.mxu1 %vm268_vm3, %v1554_v29  ;;  %v1108_v45 = vsel %vm1107_vm9, %v1102_v34, %v1104_v36 }
  0xad   : > { %1626 = vmatpush3.bf16.msra.mxu1 %v870_v31  ;;  %1627 = vmatprep.mubr.msk.bf16.mxu1 %vm1728_vm0, %v1727_v3  ;;  %v1114_v49 = vsel %vm272_vm1, %v1108_v45, 0 }
  0xae   : > { %1631 = vmatprep.subr.bf16.mxu1 %v1727_v3 }
  0xaf   : > { %v1106_v40 = vpop.permute.xlu0 %1105  ;;  %v1227_v42 = vpop.permute.xlu1 %1226 }
  0xb0   : > { %v1109_v43 = vsel %vm1107_vm9, %v1104_v36, %v1106_v40  ;;  %v1120_v46 = vsel %vm272_vm1, %v1106_v40, 0 }
  0xb1   : > { %1556 = vmatmul.mubr.msk.bf16.vlgmr.msra.gmra.mxu0 %vm268_vm3, %v1554_v29 }
  0xb2   : > { %887 = vmatpush1.bf16.msra.mxu0 %v864_v33  ;;  %904 = vmatprep.mubr.bf16.mxu0 %v1729_v6 }
  0xb3   : > { %1563 = vmatprep.subr.msk.bf16.mxu0 %vm272_vm1, %v984_v35  ;;  %v1229_v47 = vpop.permute.xlu0 %1228  ;;  %v1231_v48 = vpop.permute.xlu1 %1230 }
  0xb4   : > { %1628 = vmatmul.mubr.msk.bf16.vlgmr.msra.gmra.mxu1 %vm268_vm3, %v1558_v37  ;;  %v1234_v50 = vsel %vm1232_vm10, %v1229_v47, %v1231_v48  ;;  %v1233_v52 = vsel %vm1232_vm10, %v1227_v42, %v1229_v47  ;;  %v1245_v53 = vsel %vm272_vm1, %v1231_v48, 0 }
  0xb5   : > { %1632 = vmatpush3.bf16.msra.mxu1 %v995_v39  ;;  %1633 = vmatprep.mubr.msk.bf16.mxu1 %vm1728_vm0, %v1727_v3  ;;  %v1239_v54 = vsel %vm272_vm1, %v1233_v52, 0 }
  0xb6   : > { %1637 = vmatprep.subr.bf16.mxu1 %v1727_v3 }
  0xb9   : > { %1560 = vmatmul.mubr.msk.bf16.vlgmr.msra.gmra.mxu0 %vm268_vm3, %v1558_v37 }
  0xba   : > { %1012 = vmatpush1.bf16.msra.mxu0 %v989_v41  ;;  %1029 = vmatprep.mubr.bf16.mxu0 %v1729_v6 }
  0xbb   : > { %1567 = vmatprep.subr.msk.bf16.mxu0 %vm272_vm1, %v1109_v43 }
  0xbc   : > { %1634 = vmatmul.mubr.msk.bf16.vlgmr.msra.gmra.mxu1 %vm268_vm3, %v1562_v44 }
  0xbd   : > { %1638 = vmatpush3.bf16.msra.mxu1 %v1120_v46  ;;  %1639 = vmatprep.mubr.msk.bf16.mxu1 %vm1728_vm0, %v1727_v3 }
  0xbe   : > { %1643 = vmatprep.subr.bf16.mxu1 %v1727_v3 }
  0xc1   : > { %1564 = vmatmul.mubr.msk.bf16.vlgmr.msra.gmra.mxu0 %vm268_vm3, %v1562_v44 }
  0xc2   : > { %1137 = vmatpush1.bf16.msra.mxu0 %v1114_v49  ;;  %1154 = vmatprep.mubr.bf16.mxu0 %v1729_v6 }
  0xc3   : > { %1571 = vmatprep.subr.msk.bf16.mxu0 %vm272_vm1, %v1234_v50 }
  0xc4   : > { %1640 = vmatmul.mubr.msk.bf16.vlgmr.msra.gmra.mxu1 %vm268_vm3, %v1566_v51 }
  0xc5   : > { %1644 = vmatpush3.bf16.msra.mxu1 %v1245_v53  ;;  %1645 = vmatprep.mubr.msk.bf16.mxu1 %vm1728_vm0, %v1727_v3  ;;  %vm1443_vm0 = vmor %vm1442_vm15, %vm1441_vm14 }
  0xc9   : > { %1568 = vmatmul.mubr.msk.bf16.vlgmr.msra.gmra.mxu0 %vm268_vm3, %v1566_v51 }
  0xca   : > { %1262 = vmatpush1.bf16.msra.mxu0 %v1239_v54  ;;  %1279 = vmatprep.mubr.bf16.mxu0 %v1729_v6 }
  0xcc   : > { %1646 = vmatmul.mubr.msk.bf16.vlgmr.msra.gmra.mxu1 %vm268_vm3, %v1570_v55 }
  0xd1   : > { %1572 = vmatmul.mubr.msk.bf16.vlgmr.msra.gmra.mxu0 %vm268_vm3, %v1570_v55 }
 0x14c   : > { %v357_v56 = vpop.f32.mrf.mxu1 }
 0x14e   : > { %v1599_v57 = vpop.f32.mrf.mxu1 }
 0x150   : > { %v360_v59 = vpop.f32.mrf.mxu1 }
 0x151   : > { %v316_v58 = vpop.f32.mrf.mxu0 }
 0x152   : > { %v1600_v61 = vpop.f32.mrf.mxu1 }
 0x153   : > { %v318_v60 = vpop.f32.mrf.mxu0 }
 0x154   : > { %v450_v62 = vpop.f32.mrf.mxu1 }
 0x155   : > { %v320_v3 = vpop.f32.mrf.mxu0  ;;  %v451_v43 = vadd.f32 %v450_v62, %v357_v56 }
 0x156   : > { %v1605_v0 = vpop.f32.mrf.mxu1 }
 0x157   : > { %v321_v63 = vpop.f32.mrf.mxu0 }
 0x158   : > { %v453_v6 = vpop.f32.mrf.mxu1 }
 0x159   : > { %v409_v1 = vpop.f32.mrf.mxu0 }
 0x15a   : > { %v1606_v4 = vpop.f32.mrf.mxu1  ;;  %v410_v48 = vadd.f32 %v409_v1, %v316_v58 }
 0x15b   : > { %v411_v2 = vpop.f32.mrf.mxu0 }
 0x15c   : > { %v572_v8 = vpop.f32.mrf.mxu1  ;;  %v412_v52 = vadd.f32 %v411_v2, %v318_v60 }
 0x15d   : > { %v413_v5 = vpop.f32.mrf.mxu0  ;;  %v580_v46 = vadd.f32 %v572_v8, %v451_v43 }
 0x15e   : > { %v1611_v10 = vpop.f32.mrf.mxu1 }
 0x15f   : > { %v414_v9 = vpop.f32.mrf.mxu0 }
 0x160   : > { %v575_v12 = vpop.f32.mrf.mxu1 }
 0x161   : > { %v531_v11 = vpop.f32.mrf.mxu0 }
 0x162   : > { %v1612_v14 = vpop.f32.mrf.mxu1  ;;  %v578_v53 = vadd.f32 %v531_v11, %v410_v48 }
 0x163   : > { %v533_v13 = vpop.f32.mrf.mxu0 }
 0x164   : > { %v697_v16 = vpop.f32.mrf.mxu1  ;;  %v579_v59 = vadd.f32 %v533_v13, %v412_v52 }
 0x165   : > { %v535_v15 = vpop.f32.mrf.mxu0  ;;  %v705_v50 = vadd.f32 %v697_v16, %v580_v46 }
 0x166   : > { %v1617_v18 = vpop.f32.mrf.mxu1 }
 0x167   : > { %v536_v17 = vpop.f32.mrf.mxu0 }
 0x168   : > { %v700_v20 = vpop.f32.mrf.mxu1 }
 0x169   : > { %v656_v19 = vpop.f32.mrf.mxu0 }
 0x16a   : > { %v1618_v22 = vpop.f32.mrf.mxu1  ;;  %v703_v61 = vadd.f32 %v656_v19, %v578_v53 }
 0x16b   : > { %v658_v21 = vpop.f32.mrf.mxu0 }
 0x16c   : > { %v822_v24 = vpop.f32.mrf.mxu1  ;;  %v704_v6 = vadd.f32 %v658_v21, %v579_v59 }
 0x16d   : > { %v660_v23 = vpop.f32.mrf.mxu0  ;;  %v830_v55 = vadd.f32 %v822_v24, %v705_v50 }
 0x16e   : > { %v1623_v26 = vpop.f32.mrf.mxu1 }
 0x16f   : > { %v661_v25 = vpop.f32.mrf.mxu0 }
 0x170   : > { %v825_v28 = vpop.f32.mrf.mxu1 }
 0x171   : > { %v781_v27 = vpop.f32.mrf.mxu0 }
 0x172   : > { %v1624_v30 = vpop.f32.mrf.mxu1  ;;  %v828_v56 = vadd.f32 %v781_v27, %v703_v61 }
 0x173   : > { %v783_v29 = vpop.f32.mrf.mxu0 }
 0x174   : > { %v947_v32 = vpop.f32.mrf.mxu1  ;;  %v829_v8 = vadd.f32 %v783_v29, %v704_v6 }
 0x175   : > { %v785_v31 = vpop.f32.mrf.mxu0  ;;  %v955_v63 = vadd.f32 %v947_v32, %v830_v55 }
 0x176   : > { %v1629_v34 = vpop.f32.mrf.mxu1 }
 0x177   : > { %v786_v33 = vpop.f32.mrf.mxu0 }
 0x178   : > { %v950_v36 = vpop.f32.mrf.mxu1 }
 0x179   : > { %v906_v35 = vpop.f32.mrf.mxu0 }
 0x17a   : > { %v1630_v38 = vpop.f32.mrf.mxu1  ;;  %v953_v58 = vadd.f32 %v906_v35, %v828_v56 }
 0x17b   : > { %v908_v37 = vpop.f32.mrf.mxu0 }
 0x17c   : > { %v1072_v40 = vpop.f32.mrf.mxu1  ;;  %v954_v60 = vadd.f32 %v908_v37, %v829_v8 }
 0x17d   : > { %v910_v39 = vpop.f32.mrf.mxu0  ;;  %v1080_v4 = vadd.f32 %v1072_v40, %v955_v63 }
 0x17e   : > { %v1635_v42 = vpop.f32.mrf.mxu1 }
 0x17f   : > { %v911_v41 = vpop.f32.mrf.mxu0 }
 0x180   : > { %v1075_v45 = vpop.f32.mrf.mxu1 }
 0x181   : > { %v1031_v44 = vpop.f32.mrf.mxu0 }
 0x182   : > { %v1636_v49 = vpop.f32.mrf.mxu1  ;;  %v1078_v2 = vadd.f32 %v1031_v44, %v953_v58 }
 0x183   : > { %v1033_v47 = vpop.f32.mrf.mxu0 }
 0x184   : > { %v1197_v54 = vpop.f32.mrf.mxu1  ;;  %v1079_v14 = vadd.f32 %v1033_v47, %v954_v60 }
 0x185   : > { %v1035_v51 = vpop.f32.mrf.mxu0  ;;  %v1205_v9 = vadd.f32 %v1197_v54, %v1080_v4 }
 0x186   : > { %v1641_v3 = vpop.f32.mrf.mxu1 }
 0x187   : > { %v1036_v57 = vpop.f32.mrf.mxu0 }
 0x188   : > { %v1200_v62 = vpop.f32.mrf.mxu1 }
 0x189   : > { %v1156_v0 = vpop.f32.mrf.mxu0 }
 0x18a   : > { %v1642_v1 = vpop.f32.mrf.mxu1  ;;  %v1203_v15 = vadd.f32 %v1156_v0, %v1078_v2 }
 0x18b   : > { %v1158_v5 = vpop.f32.mrf.mxu0 }
 0x18c   : > { %v1322_v11 = vpop.f32.mrf.mxu1  ;;  %v1204_v19 = vadd.f32 %v1158_v5, %v1079_v14 }
 0x18d   : > { %v1160_v10 = vpop.f32.mrf.mxu0  ;;  %v1330_v12 = vadd.f32 %v1322_v11, %v1205_v9 }
 0x18e   : > { %v1647_v16 = vpop.f32.mrf.mxu1 }
 0x18f   : > { %v1161_v13 = vpop.f32.mrf.mxu0  ;;  %v1347_v17 = vsel %vm1346_vm11, %v1330_v12, 0.0 }
 0x190   : > { %v1348_v20 = vrot.slane %v1347_v17, 4  ;;  %v1325_v22 = vpop.f32.mrf.mxu1 }
 0x191   : > { %v1281_v18 = vpop.f32.mrf.mxu0 }
 0x192   : > { %v1328_v21 = vadd.f32 %v1281_v18, %v1203_v15  ;;  %v1349_v24 = vadd.f32 %v1348_v20, %v1347_v17  ;;  %v1648_v27 = vpop.f32.mrf.mxu1 }
 0x193   : > { %v1283_v23 = vpop.f32.mrf.mxu0 }
 0x194   : > { %v1332_v25 = vsel %vm1331_vm12, %v1328_v21, 0.0  ;;  %v1329_v26 = vadd.f32 %v1283_v23, %v1204_v19  ;;  %v1350_v30 = vrot.slane %v1349_v24, 2  ;;  %v1409_v23 = vpop.permute.xlu1 %1408 }
 0x195   : > { %v1333_v28 = vrot.slane %v1332_v25, 4  ;;  %v1285_v29 = vpop.f32.mrf.mxu0 }
 0x196   : > { %v1339_v31 = vsel %vm1331_vm12, %v1329_v26, 0.0  ;;  %v1351_v35 = vadd.f32 %v1350_v30, %v1349_v24 }
 0x197   : > { %v1334_v32 = vadd.f32 %v1333_v28, %v1332_v25  ;;  %v1340_v33 = vrot.slane %v1339_v31, 4  ;;  %v1286_v34 = vpop.f32.mrf.mxu0 }
 0x198   : > { %v1352_v38 = vrot.slane %v1351_v35, 1 }
 0x199   : > { %v1335_v36 = vrot.slane %v1334_v32, 2  ;;  %v1341_v37 = vadd.f32 %v1340_v33, %v1339_v31 }
 0x19a   : > { %v1353_v41 = vadd.f32 %v1352_v38, %v1351_v35 }
 0x19b   : > { %v1336_v39 = vadd.f32 %v1335_v36, %v1334_v32  ;;  %v1342_v40 = vrot.slane %v1341_v37, 2 }
 0x19c   : > { %v1356_v44 = vmul.f32 0.25, %v1353_v41 }
 0x19d   : > { %v1337_v42 = vrot.slane %v1336_v39, 1  ;;  %v1343_v43 = vadd.f32 %v1342_v40, %v1341_v37 }
 0x19e   : > { %v1359_v47 = vsub.f32 %v1330_v12, %v1356_v44 }
 0x19f   : > { %v1338_v45 = vadd.f32 %v1337_v42, %v1336_v39  ;;  %v1344_v46 = vrot.slane %v1343_v43, 1 }
 0x1a0   : > { %v1362_v50 = vmul.f32 %v1359_v47, %v1359_v47 }
 0x1a1   : > { %v1354_v48 = vmul.f32 0.25, %v1338_v45  ;;  %v1345_v49 = vadd.f32 %v1344_v46, %v1343_v43 }
 0x1a2   : > { %v1377_v53 = vsel %vm1346_vm11, %v1362_v50, 0.0 }
 0x1a3   : > { %v1357_v51 = vsub.f32 %v1328_v21, %v1354_v48  ;;  %v1355_v52 = vmul.f32 0.25, %v1345_v49  ;;  %v1378_v54 = vrot.slane %v1377_v53, 4  ;;  %v1400_v21 = vpop.permute.xlu0 %1399 }
 0x1a5   : > { %v1360_v55 = vmul.f32 %v1357_v51, %v1357_v51  ;;  %v1358_v57 = vsub.f32 %v1329_v26, %v1355_v52  ;;  %v1379_v59 = vadd.f32 %v1378_v54, %v1377_v53 }
 0x1a7   : > { %v1363_v61 = vsel %vm1331_vm12, %v1360_v55, 0.0  ;;  %v1361_v3 = vmul.f32 %v1358_v57, %v1358_v57  ;;  %v1380_v0 = vrot.slane %v1379_v59, 2 }
 0x1a8   : > { %v1364_v63 = vrot.slane %v1363_v61, 4 }
 0x1a9   : > { %v1370_v6 = vsel %vm1331_vm12, %v1361_v3, 0.0  ;;  %v1381_v4 = vadd.f32 %v1380_v0, %v1379_v59 }
 0x1aa   : > { %v1365_v56 = vadd.f32 %v1364_v63, %v1363_v61  ;;  %v1371_v62 = vrot.slane %v1370_v6, 4 }
 0x1ab   : > { %v1382_v58 = vrot.slane %v1381_v4, 1 }
 0x1ac   : > { %v1366_v5 = vrot.slane %v1365_v56, 2  ;;  %v1372_v8 = vadd.f32 %v1371_v62, %v1370_v6 }
 0x1ad   : > { %v1383_v10 = vadd.f32 %v1382_v58, %v1381_v4 }
 0x1ae   : > { %v1367_v1 = vadd.f32 %v1366_v5, %v1365_v56  ;;  %v1373_v9 = vrot.slane %v1372_v8, 2 }
 0x1af   : > { %v1386_v11 = vmul.f32 0.25, %v1383_v10 }
 0x1b0   : > { %v1368_v60 = vrot.slane %v1367_v1, 1  ;;  %v1374_v2 = vadd.f32 %v1373_v9, %v1372_v8 }
 0x1b1   : > { %v1389_v14 = vadd.f32 1e-06, %v1386_v11 }
 0x1b2   : > { %v1369_v12 = vadd.f32 %v1368_v60, %v1367_v1  ;;  %v1375_v13 = vrot.slane %v1374_v2, 1 }
 0x1b3   : > { %1696 = vrsqrt.f32 %v1389_v14 }
 0x1b4   : > { %v1384_v15 = vmul.f32 0.25, %v1369_v12  ;;  %v1376_v16 = vadd.f32 %v1375_v13, %v1374_v2 }
 0x1b6   : > { %v1387_v17 = vadd.f32 1e-06, %v1384_v15  ;;  %v1385_v18 = vmul.f32 0.25, %v1376_v16 }
 0x1b8   : > { %1698 = vrsqrt.f32 %v1387_v17  ;;  %v1388_v19 = vadd.f32 1e-06, %v1385_v18 }
 0x1ba   : > { %1700 = vrsqrt.f32 %v1388_v19 }
 0x1c0   : > { %v1697_v20 = vpop.eup %1696 }
 0x1c1   : > { %v1395_v22 = vmul.f32 %v1697_v20, %v1359_v47 }
 0x1c3   : > { %v1404_v25 = vmul.f32 %v1400_v21, %v1395_v22 }
 0x1c5   : > { %v1699_v24 = vpop.eup %1698  ;;  %v1413_v28 = vadd.f32 %v1409_v23, %v1404_v25 }
 0x1c6   : > { %v1393_v26 = vmul.f32 %v1699_v24, %v1357_v51 }
 0x1c7   : > { %v1701_v27 = vpop.eup %1700  ;;  %v1416_v33 = vmax.f32 %v1413_v28, 0.0 }
 0x1c8   : > { %v1394_v29 = vmul.f32 %v1701_v27, %v1358_v57  ;;  %v1402_v30 = vmul.f32 %v1400_v21, %v1393_v26 }
 0x1c9   : > { %v1419_v37 = vpack.c.bf16 %v1416_v33, %v1416_v33 }
 0x1ca   : > { %v1403_v31 = vmul.f32 %v1400_v21, %v1394_v29  ;;  %v1411_v32 = vadd.f32 %v1409_v23, %v1402_v30 }
 0x1cb   : > { %v1437_v40 = vrot.slane %v1419_v37, %v1789_v7 }
 0x1cc   : > { %v1412_v34 = vadd.f32 %v1409_v23, %v1403_v31  ;;  %v1414_v35 = vmax.f32 %v1411_v32, 0.0 }
 0x1ce   : > { %v1415_v36 = vmax.f32 %v1412_v34, 0.0 }
 0x1d0   : > { %v1574_v38 = vpack.c.bf16 %v1415_v36, %v1414_v35 }
 0x1d2   : > { %v1430_v39 = vrot.slane %v1574_v38, %v1789_v7 }
 0x1d4   : > { %v1438_v41 = vcombine.low %v1430_v39, %v1437_v40 }
 0x1d6   : > { %1444 = vst.msk [vmem:[%s235_s8] sm:$0x3f] %vm1443_vm0, %v1438_v41 }
 0x1d7 PF: > { %s14_s17 = sadd.s32 1, %s1724_s17   ;;  %s1977_s15 = smov %s1720_s16 }
 0x1d8   : > { %p11_p5 = scmp.ge.s32.totalorder %s14_s17, 4   ;;  %s1978_s16 = smov %s1980_s18 }
 0x1da   :  { %13 = sbr.rel (!%p11_p5) target bundleno = 2 (0x2), region = 74 }

</bundles_post_ra>
